<compile_context>
chip_gen: v7x
topology: tpu7x:2x2x1
jax: 0.10.0
libtpu: 0.0.40
codegen_flags: <defaults>
</compile_context>

<pallas_src>
import numpy as np
import jax
import jax.numpy as jnp
from jax import lax
from jax.experimental import pallas as pl
from jax.experimental.pallas import tpu as pltpu


def _round_up(x, m):
    return (x + m - 1) // m * m


def _make_dense_block_kernel(layer_meta, H, W, pad):
    """layer_meta: list of (K, cp, gp) = (padded input rows, padded 1x1-out rows,
    padded growth rows) per layer."""
    HW = H * W
    n_layers = len(layer_meta)

    def kernel(*refs):
        mask_ref = refs[0]                       # (3, 1, HW) column-wrap masks
        x_ref = refs[1]                          # (1, cp0, HW) padded input
        w_refs = refs[2:2 + 4 * n_layers]
        o_ref = refs[2 + 4 * n_layers]           # (1, total_pad, HW)
        tp_ref = refs[3 + 4 * n_layers]          # (max_cp, HW + 2*pad) line buf
        patch_ref = refs[4 + 4 * n_layers]       # (9*max_cp, HW) im2col patch

        # zero-padded halo of the line buffer (never written afterwards)
        tp_ref[...] = jnp.zeros_like(tp_ref)

        # seed the (padded, channels-first) feature map with the block input
        cp0 = x_ref.shape[1]
        o_ref[0, 0:cp0, :] = x_ref[0]

        for d, (K, cp, gp) in enumerate(layer_meta):
            w1 = w_refs[4 * d][...]              # (cp, K)    1x1 weight (out,in)
            b1 = w_refs[4 * d + 1][...]          # (cp, 1)
            w3 = w_refs[4 * d + 2][...]          # (gp, 9*cp) 3x3 weight, tap-major
            b3 = w_refs[4 * d + 3][...]          # (gp, 1)

            xin = o_ref[0, 0:K, :]               # all channels written so far

            # ---- 1x1 conv + ReLU (padded out-rows are exactly zero) ---------
            t = jnp.maximum(
                jnp.dot(w1, xin, preferred_element_type=jnp.float32) + b1, 0.0)

            # ---- 3x3 'same' conv: shifted slices of a zero-padded buffer ----
            tp_ref[0:cp, pad:pad + HW] = t       # aligned interior store
            for tap in range(9):
                oy, ox = tap // 3 - 1, tap % 3 - 1
                s = oy * W + ox
                sl = tp_ref[0:cp, pad + s:pad + s + HW]   # t[:, p+s], 0 outside
                if ox != 0:
                    sl = sl * mask_ref[ox + 1]            # kill column wrap
                patch_ref[tap * cp:(tap + 1) * cp, :] = sl
            patch = patch_ref[0:9 * cp, :]                # (9*cp, HW) im2col

            # ---- one MXU matmul + bias + ReLU, write growth slice in place --
            h = jnp.maximum(
                jnp.dot(w3, patch, preferred_element_type=jnp.float32) + b3, 0.0)
            o_ref[0, K:K + gp, :] = h.astype(o_ref.dtype)

    return kernel


def dense_block_forward(x_nchw, params):
    """x: (N, C, H, W) NCHW -> (N, C_out, H, W); matches DenseBlock.forward."""
    N, C0, H, W = x_nchw.shape
    HW = H * W
    pad = _round_up(W + 1, 128)                  # aligned zero halo, >= W+1

    # ---- padded channels-first layout bookkeeping ---------------------------
    seg_real = [C0] + [w3.shape[3] for (_, _, w3, _) in params]
    seg_pad = [_round_up(c, 8) for c in seg_real]
    seg_base = np.concatenate([[0], np.cumsum(seg_pad)[:-1]]).astype(np.int64)
    total_pad = int(np.sum(seg_pad))
    C_out = int(np.sum(seg_real))
    # dense-concat channel index -> padded row index
    pad_row = np.concatenate(
        [seg_base[s] + np.arange(seg_real[s]) for s in range(len(seg_real))])

    # ---- per-layer channels-first, zero-padded weights ----------------------
    flat_w, layer_meta = [], []
    cin_real = C0
    for d, (w1, b1, w3, b3) in enumerate(params):
        g = w3.shape[3]
        K = int(np.sum(seg_pad[:d + 1]))         # padded input rows
        cp = _round_up(cin_real, 8)              # padded 1x1 output channels
        gp = seg_pad[d + 1]                      # padded growth channels
        idx = pad_row[:cin_real]                 # real input ch -> padded row

        w1_oi = jnp.transpose(w1[0, 0])          # (out=cin, in=cin)
        w1p = jnp.zeros((cp, K), jnp.float32).at[:cin_real, idx].set(w1_oi)
        b1p = jnp.zeros((cp, 1), jnp.float32).at[:cin_real, 0].set(b1)

        w3_t = jnp.transpose(w3.reshape(9, cin_real, g), (2, 0, 1))  # (g,9,cin)
        w3p = (jnp.zeros((gp, 9, cp), jnp.float32)
               .at[:g, :, :cin_real].set(w3_t).reshape(gp, 9 * cp))
        b3p = jnp.zeros((gp, 1), jnp.float32).at[:g, 0].set(b3)

        flat_w += [w1p, b1p, w3p, b3p]
        layer_meta.append((K, cp, gp))
        cin_real += g

    max_cp = max(cp for (_, cp, _) in layer_meta)

    # ---- column-wrap masks (depend only on the horizontal tap offset) -------
    j = jnp.arange(HW, dtype=jnp.int32) % W
    mask = jnp.stack([(j >= 1).astype(jnp.float32),          # ox = -1
                      jnp.ones((HW,), jnp.float32),          # ox =  0
                      (j <= W - 2).astype(jnp.float32)],     # ox = +1
                     axis=0).reshape(3, 1, HW)

    # ---- padded channels-first input (no transpose needed from NCHW) --------
    cp0 = seg_pad[0]
    x_cf = (jnp.zeros((N, cp0, HW), jnp.float32)
            .at[:, :C0, :].set(x_nchw.reshape(N, C0, HW).astype(jnp.float32)))

    kernel = _make_dense_block_kernel(layer_meta, H, W, pad)

    in_specs = [pl.BlockSpec((3, 1, HW), lambda n: (0, 0, 0)),
                pl.BlockSpec((1, cp0, HW), lambda n: (n, 0, 0))]
    in_specs += [pl.BlockSpec(w.shape, lambda n: (0, 0)) for w in flat_w]

    out_p = pl.pallas_call(
        kernel,
        out_shape=jax.ShapeDtypeStruct((N, total_pad, HW), jnp.float32),
        grid=(N,),
        in_specs=in_specs,
        out_specs=pl.BlockSpec((1, total_pad, HW), lambda n: (n, 0, 0)),
        scratch_shapes=[pltpu.VMEM((max_cp, HW + 2 * pad), jnp.float32),
                        pltpu.VMEM((9 * max_cp, HW), jnp.float32)],
        compiler_params=pltpu.CompilerParams(
            dimension_semantics=("parallel",)),
    )(mask, x_cf, *flat_w)

    # strip the channel padding once (tiny), back to NCHW spatial shape
    chunks = [out_p[:, int(seg_base[s]):int(seg_base[s]) + seg_real[s], :]
              for s in range(len(seg_real))]
    return jnp.concatenate(chunks, axis=1).reshape(N, C_out, H, W)


def init_dense_block_params(key, n_inputs, n_outputs, depth):
    """Deterministic synthetic parameters, mirroring DenseBlock.__init__ shapes."""
    params = []
    future_growth = n_outputs - n_inputs
    c = n_inputs
    for d in range(depth):
        growth = future_growth // (depth - d)
        k1, k2, k3, k4, key = jax.random.split(key, 5)
        w1 = jax.random.normal(k1, (1, 1, c, c), jnp.float32) * 0.2   # HWIO
        b1 = jax.random.normal(k2, (c,), jnp.float32) * 0.1
        w3 = jax.random.normal(k3, (3, 3, c, growth), jnp.float32) * 0.1
        b3 = jax.random.normal(k4, (growth,), jnp.float32) * 0.1
        params.append((w1, b1, w3, b3))
        c += growth
        future_growth -= growth
    return params


# ----------------------------- plain-JAX reference -----------------------------
def _conv_relu_ref(x_nhwc, w_hwio, b):
    dn = lax.conv_dimension_numbers(x_nhwc.shape, w_hwio.shape,
                                    ("NHWC", "HWIO", "NHWC"))
    y = lax.conv_general_dilated(x_nhwc, w_hwio, (1, 1), "SAME",
                                 dimension_numbers=dn) + b
    return jnp.maximum(y, 0.0)


def dense_block_ref(x_nchw, params):
    x = jnp.transpose(x_nchw, (0, 2, 3, 1))
    for (w1, b1, w3, b3) in params:
        t = _conv_relu_ref(x, w1, b1)
        h = _conv_relu_ref(t, w3, b3)
        x = jnp.concatenate([x, h], axis=-1)
    return jnp.transpose(x, (0, 3, 1, 2))


if __name__ == "__main__":
    key = jax.random.PRNGKey(0)
    kx, kp = jax.random.split(key)

    # args.densenet_depth = 2, n_inputs = 4, n_outputs = 16
    N, C_IN, H, W = 2, 4, 16, 16
    C_OUT, DEPTH = 16, 2

    # TODO(synk): quantize/pruning branches of get_conv (w_bits/a_bits/wq_level)
    # are modelled as the plain float conv path.
    x = jax.random.normal(kx, (N, C_IN, H, W), jnp.float32)
    params = init_dense_block_params(kp, C_IN, C_OUT, DEPTH)

    out = jax.block_until_ready(dense_block_forward(x, params))
    ref = jax.block_until_ready(dense_block_ref(x, params))

    assert out.shape == (N, C_OUT, H, W), out.shape
    max_err = float(jnp.max(jnp.abs(out - ref)))
    assert jnp.allclose(out, ref, atol=2e-4, rtol=2e-4), f"max_err={max_err}"
    print("KERNEL_OK")
</pallas_src>

<mosaic_0001>
module attributes {stable_mosaic.version = 11 : i64} {
  func.func @kernel(%arg0: i32, %arg1: memref<3x1x256xf32, #tpu.memory_space<vmem>>, %arg2: memref<1x8x256xf32, #tpu.memory_space<vmem>>, %arg3: memref<8x8xf32, #tpu.memory_space<vmem>>, %arg4: memref<8x1xf32, #tpu.memory_space<vmem>>, %arg5: memref<8x72xf32, #tpu.memory_space<vmem>>, %arg6: memref<8x1xf32, #tpu.memory_space<vmem>>, %arg7: memref<16x16xf32, #tpu.memory_space<vmem>>, %arg8: memref<16x1xf32, #tpu.memory_space<vmem>>, %arg9: memref<8x144xf32, #tpu.memory_space<vmem>>, %arg10: memref<8x1xf32, #tpu.memory_space<vmem>>, %arg11: memref<1x24x256xf32, #tpu.memory_space<vmem>>, %arg12: memref<16x512xf32, #tpu.memory_space<vmem>>, %arg13: memref<144x256xf32, #tpu.memory_space<vmem>>) attributes {dimension_semantics = [#tpu.dimension_semantics<parallel>], iteration_bounds = array<i64: 2>, scalar_prefetch = 0 : i64, scratch_operands = 2 : i64, tpu.core_type = #tpu.core_type<tc>, window_params = [{pipeline_mode = #tpu.pipeline_mode<synchronous>, transform_indices = @transform_0, window_bounds = array<i64: 3, 1, 256>}, {transform_indices = @transform_1, window_bounds = array<i64: 1, 8, 256>}, {pipeline_mode = #tpu.pipeline_mode<synchronous>, transform_indices = @transform_2, window_bounds = array<i64: 8, 8>}, {pipeline_mode = #tpu.pipeline_mode<synchronous>, transform_indices = @transform_3, window_bounds = array<i64: 8, 1>}, {pipeline_mode = #tpu.pipeline_mode<synchronous>, transform_indices = @transform_4, window_bounds = array<i64: 8, 72>}, {pipeline_mode = #tpu.pipeline_mode<synchronous>, transform_indices = @transform_5, window_bounds = array<i64: 8, 1>}, {pipeline_mode = #tpu.pipeline_mode<synchronous>, transform_indices = @transform_6, window_bounds = array<i64: 16, 16>}, {pipeline_mode = #tpu.pipeline_mode<synchronous>, transform_indices = @transform_7, window_bounds = array<i64: 16, 1>}, {pipeline_mode = #tpu.pipeline_mode<synchronous>, transform_indices = @transform_8, window_bounds = array<i64: 8, 144>}, {pipeline_mode = #tpu.pipeline_mode<synchronous>, transform_indices = @transform_9, window_bounds = array<i64: 8, 1>}, {transform_indices = @transform_10, window_bounds = array<i64: 1, 24, 256>}]} {
    %cst = arith.constant 0.000000e+00 : f32
    %0 = vector.broadcast %cst : f32 to vector<16x512xf32>
    %c0 = arith.constant 0 : index
    %c0_0 = arith.constant 0 : index
    %1 = vector.load %arg12[%c0, %c0_0] : memref<16x512xf32, #tpu.memory_space<vmem>>, vector<16x512xf32>
    tpu.vector_store %arg12[%c0, %c0_0], %0 {strides = array<i32>} : memref<16x512xf32, #tpu.memory_space<vmem>>, vector<16x512xf32>,
    %c0_1 = arith.constant 0 : index
    %c0_2 = arith.constant 0 : index
    %c0_3 = arith.constant 0 : index
    %2 = vector.load %arg2[%c0_1, %c0_2, %c0_3] : memref<1x8x256xf32, #tpu.memory_space<vmem>>, vector<1x8x256xf32>
    %3 = vector.shape_cast %2 : vector<1x8x256xf32> to vector<8x256xf32>
    %c0_4 = arith.constant 0 : index
    %c0_5 = arith.constant 0 : index
    %c0_6 = arith.constant 0 : index
    %4 = vector.load %arg11[%c0_4, %c0_5, %c0_6] : memref<1x24x256xf32, #tpu.memory_space<vmem>>, vector<1x8x256xf32>
    %5 = vector.shape_cast %4 : vector<1x8x256xf32> to vector<8x256xf32>
    %6 = vector.shape_cast %3 : vector<8x256xf32> to vector<1x8x256xf32>
    tpu.vector_store %arg11[%c0_4, %c0_5, %c0_6], %6 {strides = array<i32>} : memref<1x24x256xf32, #tpu.memory_space<vmem>>, vector<1x8x256xf32>,
    %c0_7 = arith.constant 0 : index
    %c0_8 = arith.constant 0 : index
    %7 = vector.load %arg3[%c0_7, %c0_8] : memref<8x8xf32, #tpu.memory_space<vmem>>, vector<8x8xf32>
    %c0_9 = arith.constant 0 : index
    %c0_10 = arith.constant 0 : index
    %8 = vector.load %arg4[%c0_9, %c0_10] : memref<8x1xf32, #tpu.memory_space<vmem>>, vector<8x1xf32>
    %c0_11 = arith.constant 0 : index
    %c0_12 = arith.constant 0 : index
    %9 = vector.load %arg5[%c0_11, %c0_12] : memref<8x72xf32, #tpu.memory_space<vmem>>, vector<8x72xf32>
    %c0_13 = arith.constant 0 : index
    %c0_14 = arith.constant 0 : index
    %10 = vector.load %arg6[%c0_13, %c0_14] : memref<8x1xf32, #tpu.memory_space<vmem>>, vector<8x1xf32>
    %c0_15 = arith.constant 0 : index
    %c0_16 = arith.constant 0 : index
    %c0_17 = arith.constant 0 : index
    %11 = vector.load %arg11[%c0_15, %c0_16, %c0_17] : memref<1x24x256xf32, #tpu.memory_space<vmem>>, vector<1x8x256xf32>
    %12 = vector.shape_cast %11 : vector<1x8x256xf32> to vector<8x256xf32>
    %cst_18 = arith.constant dense<0.000000e+00> : vector<8x256xf32>
    %13 = tpu.matmul %7, %12, %cst_18 {dimension_numbers = #tpu.dot_dimension_numbers<[1], [0], [0], [1], [0, 0, 1, 1], [], []>} : vector<8x8xf32>, vector<8x256xf32>, vector<8x256xf32> -> vector<8x256xf32>
    %14 = vector.broadcast %8 : vector<8x1xf32> to vector<8x256xf32>
    %15 = arith.addf %13, %14 : vector<8x256xf32>
    %cst_19 = arith.constant 0.000000e+00 : f32
    %16 = vector.broadcast %cst_19 : f32 to vector<8x256xf32>
    %17 = arith.maximumf %15, %16 : vector<8x256xf32>
    %c0_20 = arith.constant 0 : index
    %c128 = arith.constant 128 : index
    %18 = vector.load %arg12[%c0_20, %c128] : memref<16x512xf32, #tpu.memory_space<vmem>>, vector<8x256xf32>
    tpu.vector_store %arg12[%c0_20, %c128], %17 {strides = array<i32>} : memref<16x512xf32, #tpu.memory_space<vmem>>, vector<8x256xf32>,
    %c0_21 = arith.constant 0 : index
    %c111 = arith.constant 111 : index
    %19 = vector.load %arg12[%c0_21, %c111] : memref<16x512xf32, #tpu.memory_space<vmem>>, vector<8x256xf32>
    %c0_22 = arith.constant 0 : index
    %c0_23 = arith.constant 0 : index
    %c0_24 = arith.constant 0 : index
    %20 = vector.load %arg1[%c0_22, %c0_23, %c0_24] : memref<3x1x256xf32, #tpu.memory_space<vmem>>, vector<1x1x256xf32>
    %21 = vector.shape_cast %20 : vector<1x1x256xf32> to vector<1x256xf32>
    %22 = vector.broadcast %21 : vector<1x256xf32> to vector<8x256xf32>
    %23 = arith.mulf %19, %22 : vector<8x256xf32>
    %c0_25 = arith.constant 0 : index
    %c0_26 = arith.constant 0 : index
    %24 = vector.load %arg13[%c0_25, %c0_26] : memref<144x256xf32, #tpu.memory_space<vmem>>, vector<8x256xf32>
    tpu.vector_store %arg13[%c0_25, %c0_26], %23 {strides = array<i32>} : memref<144x256xf32, #tpu.memory_space<vmem>>, vector<8x256xf32>,
    %c0_27 = arith.constant 0 : index
    %c112 = arith.constant 112 : index
    %25 = vector.load %arg12[%c0_27, %c112] : memref<16x512xf32, #tpu.memory_space<vmem>>, vector<8x256xf32>
    %c8 = arith.constant 8 : index
    %c0_28 = arith.constant 0 : index
    %26 = vector.load %arg13[%c8, %c0_28] : memref<144x256xf32, #tpu.memory_space<vmem>>, vector<8x256xf32>
    tpu.vector_store %arg13[%c8, %c0_28], %25 {strides = array<i32>} : memref<144x256xf32, #tpu.memory_space<vmem>>, vector<8x256xf32>,
    %c0_29 = arith.constant 0 : index
    %c113 = arith.constant 113 : index
    %27 = vector.load %arg12[%c0_29, %c113] : memref<16x512xf32, #tpu.memory_space<vmem>>, vector<8x256xf32>
    %c2 = arith.constant 2 : index
    %c0_30 = arith.constant 0 : index
    %c0_31 = arith.constant 0 : index
    %28 = vector.load %arg1[%c2, %c0_30, %c0_31] : memref<3x1x256xf32, #tpu.memory_space<vmem>>, vector<1x1x256xf32>
    %29 = vector.shape_cast %28 : vector<1x1x256xf32> to vector<1x256xf32>
    %30 = vector.broadcast %29 : vector<1x256xf32> to vector<8x256xf32>
    %31 = arith.mulf %27, %30 : vector<8x256xf32>
    %c16 = arith.constant 16 : index
    %c0_32 = arith.constant 0 : index
    %32 = vector.load %arg13[%c16, %c0_32] : memref<144x256xf32, #tpu.memory_space<vmem>>, vector<8x256xf32>
    tpu.vector_store %arg13[%c16, %c0_32], %31 {strides = array<i32>} : memref<144x256xf32, #tpu.memory_space<vmem>>, vector<8x256xf32>,
    %c0_33 = arith.constant 0 : index
    %c127 = arith.constant 127 : index
    %33 = vector.load %arg12[%c0_33, %c127] : memref<16x512xf32, #tpu.memory_space<vmem>>, vector<8x256xf32>
    %c0_34 = arith.constant 0 : index
    %c0_35 = arith.constant 0 : index
    %c0_36 = arith.constant 0 : index
    %34 = vector.load %arg1[%c0_34, %c0_35, %c0_36] : memref<3x1x256xf32, #tpu.memory_space<vmem>>, vector<1x1x256xf32>
    %35 = vector.shape_cast %34 : vector<1x1x256xf32> to vector<1x256xf32>
    %36 = vector.broadcast %35 : vector<1x256xf32> to vector<8x256xf32>
    %37 = arith.mulf %33, %36 : vector<8x256xf32>
    %c24 = arith.constant 24 : index
    %c0_37 = arith.constant 0 : index
    %38 = vector.load %arg13[%c24, %c0_37] : memref<144x256xf32, #tpu.memory_space<vmem>>, vector<8x256xf32>
    tpu.vector_store %arg13[%c24, %c0_37], %37 {strides = array<i32>} : memref<144x256xf32, #tpu.memory_space<vmem>>, vector<8x256xf32>,
    %c0_38 = arith.constant 0 : index
    %c128_39 = arith.constant 128 : index
    %39 = vector.load %arg12[%c0_38, %c128_39] : memref<16x512xf32, #tpu.memory_space<vmem>>, vector<8x256xf32>
    %c32 = arith.constant 32 : index
    %c0_40 = arith.constant 0 : index
    %40 = vector.load %arg13[%c32, %c0_40] : memref<144x256xf32, #tpu.memory_space<vmem>>, vector<8x256xf32>
    tpu.vector_store %arg13[%c32, %c0_40], %39 {strides = array<i32>} : memref<144x256xf32, #tpu.memory_space<vmem>>, vector<8x256xf32>,
    %c0_41 = arith.constant 0 : index
    %c129 = arith.constant 129 : index
    %41 = vector.load %arg12[%c0_41, %c129] : memref<16x512xf32, #tpu.memory_space<vmem>>, vector<8x256xf32>
    %c2_42 = arith.constant 2 : index
    %c0_43 = arith.constant 0 : index
    %c0_44 = arith.constant 0 : index
    %42 = vector.load %arg1[%c2_42, %c0_43, %c0_44] : memref<3x1x256xf32, #tpu.memory_space<vmem>>, vector<1x1x256xf32>
    %43 = vector.shape_cast %42 : vector<1x1x256xf32> to vector<1x256xf32>
    %44 = vector.broadcast %43 : vector<1x256xf32> to vector<8x256xf32>
    %45 = arith.mulf %41, %44 : vector<8x256xf32>
    %c40 = arith.constant 40 : index
    %c0_45 = arith.constant 0 : index
    %46 = vector.load %arg13[%c40, %c0_45] : memref<144x256xf32, #tpu.memory_space<vmem>>, vector<8x256xf32>
    tpu.vector_store %arg13[%c40, %c0_45], %45 {strides = array<i32>} : memref<144x256xf32, #tpu.memory_space<vmem>>, vector<8x256xf32>,
    %c0_46 = arith.constant 0 : index
    %c143 = arith.constant 143 : index
    %47 = vector.load %arg12[%c0_46, %c143] : memref<16x512xf32, #tpu.memory_space<vmem>>, vector<8x256xf32>
    %c0_47 = arith.constant 0 : index
    %c0_48 = arith.constant 0 : index
    %c0_49 = arith.constant 0 : index
    %48 = vector.load %arg1[%c0_47, %c0_48, %c0_49] : memref<3x1x256xf32, #tpu.memory_space<vmem>>, vector<1x1x256xf32>
    %49 = vector.shape_cast %48 : vector<1x1x256xf32> to vector<1x256xf32>
    %50 = vector.broadcast %49 : vector<1x256xf32> to vector<8x256xf32>
    %51 = arith.mulf %47, %50 : vector<8x256xf32>
    %c48 = arith.constant 48 : index
    %c0_50 = arith.constant 0 : index
    %52 = vector.load %arg13[%c48, %c0_50] : memref<144x256xf32, #tpu.memory_space<vmem>>, vector<8x256xf32>
    tpu.vector_store %arg13[%c48, %c0_50], %51 {strides = array<i32>} : memref<144x256xf32, #tpu.memory_space<vmem>>, vector<8x256xf32>,
    %c0_51 = arith.constant 0 : index
    %c144 = arith.constant 144 : index
    %53 = vector.load %arg12[%c0_51, %c144] : memref<16x512xf32, #tpu.memory_space<vmem>>, vector<8x256xf32>
    %c56 = arith.constant 56 : index
    %c0_52 = arith.constant 0 : index
    %54 = vector.load %arg13[%c56, %c0_52] : memref<144x256xf32, #tpu.memory_space<vmem>>, vector<8x256xf32>
    tpu.vector_store %arg13[%c56, %c0_52], %53 {strides = array<i32>} : memref<144x256xf32, #tpu.memory_space<vmem>>, vector<8x256xf32>,
    %c0_53 = arith.constant 0 : index
    %c145 = arith.constant 145 : index
    %55 = vector.load %arg12[%c0_53, %c145] : memref<16x512xf32, #tpu.memory_space<vmem>>, vector<8x256xf32>
    %c2_54 = arith.constant 2 : index
    %c0_55 = arith.constant 0 : index
    %c0_56 = arith.constant 0 : index
    %56 = vector.load %arg1[%c2_54, %c0_55, %c0_56] : memref<3x1x256xf32, #tpu.memory_space<vmem>>, vector<1x1x256xf32>
    %57 = vector.shape_cast %56 : vector<1x1x256xf32> to vector<1x256xf32>
    %58 = vector.broadcast %57 : vector<1x256xf32> to vector<8x256xf32>
    %59 = arith.mulf %55, %58 : vector<8x256xf32>
    %c64 = arith.constant 64 : index
    %c0_57 = arith.constant 0 : index
    %60 = vector.load %arg13[%c64, %c0_57] : memref<144x256xf32, #tpu.memory_space<vmem>>, vector<8x256xf32>
    tpu.vector_store %arg13[%c64, %c0_57], %59 {strides = array<i32>} : memref<144x256xf32, #tpu.memory_space<vmem>>, vector<8x256xf32>,
    %c0_58 = arith.constant 0 : index
    %c0_59 = arith.constant 0 : index
    %61 = vector.load %arg13[%c0_58, %c0_59] : memref<144x256xf32, #tpu.memory_space<vmem>>, vector<72x256xf32>
    %cst_60 = arith.constant dense<0.000000e+00> : vector<8x256xf32>
    %62 = tpu.matmul %9, %61, %cst_60 {dimension_numbers = #tpu.dot_dimension_numbers<[1], [0], [0], [1], [0, 0, 1, 1], [], []>} : vector<8x72xf32>, vector<72x256xf32>, vector<8x256xf32> -> vector<8x256xf32>
    %63 = vector.broadcast %10 : vector<8x1xf32> to vector<8x256xf32>
    %64 = arith.addf %62, %63 : vector<8x256xf32>
    %cst_61 = arith.constant 0.000000e+00 : f32
    %65 = vector.broadcast %cst_61 : f32 to vector<8x256xf32>
    %66 = arith.maximumf %64, %65 : vector<8x256xf32>
    %c0_62 = arith.constant 0 : index
    %c8_63 = arith.constant 8 : index
    %c0_64 = arith.constant 0 : index
    %67 = vector.load %arg11[%c0_62, %c8_63, %c0_64] : memref<1x24x256xf32, #tpu.memory_space<vmem>>, vector<1x8x256xf32>
    %68 = vector.shape_cast %67 : vector<1x8x256xf32> to vector<8x256xf32>
    %69 = vector.shape_cast %66 : vector<8x256xf32> to vector<1x8x256xf32>
    tpu.vector_store %arg11[%c0_62, %c8_63, %c0_64], %69 {strides = array<i32>} : memref<1x24x256xf32, #tpu.memory_space<vmem>>, vector<1x8x256xf32>,
    %c0_65 = arith.constant 0 : index
    %c0_66 = arith.constant 0 : index
    %70 = vector.load %arg7[%c0_65, %c0_66] : memref<16x16xf32, #tpu.memory_space<vmem>>, vector<16x16xf32>
    %c0_67 = arith.constant 0 : index
    %c0_68 = arith.constant 0 : index
    %71 = vector.load %arg8[%c0_67, %c0_68] : memref<16x1xf32, #tpu.memory_space<vmem>>, vector<16x1xf32>
    %c0_69 = arith.constant 0 : index
    %c0_70 = arith.constant 0 : index
    %72 = vector.load %arg9[%c0_69, %c0_70] : memref<8x144xf32, #tpu.memory_space<vmem>>, vector<8x144xf32>
    %c0_71 = arith.constant 0 : index
    %c0_72 = arith.constant 0 : index
    %73 = vector.load %arg10[%c0_71, %c0_72] : memref<8x1xf32, #tpu.memory_space<vmem>>, vector<8x1xf32>
    %c0_73 = arith.constant 0 : index
    %c0_74 = arith.constant 0 : index
    %c0_75 = arith.constant 0 : index
    %74 = vector.load %arg11[%c0_73, %c0_74, %c0_75] : memref<1x24x256xf32, #tpu.memory_space<vmem>>, vector<1x16x256xf32>
    %75 = vector.shape_cast %74 : vector<1x16x256xf32> to vector<16x256xf32>
    %cst_76 = arith.constant dense<0.000000e+00> : vector<16x256xf32>
    %76 = tpu.matmul %70, %75, %cst_76 {dimension_numbers = #tpu.dot_dimension_numbers<[1], [0], [0], [1], [0, 0, 1, 1], [], []>} : vector<16x16xf32>, vector<16x256xf32>, vector<16x256xf32> -> vector<16x256xf32>
    %77 = vector.broadcast %71 : vector<16x1xf32> to vector<16x256xf32>
    %78 = arith.addf %76, %77 : vector<16x256xf32>
    %cst_77 = arith.constant 0.000000e+00 : f32
    %79 = vector.broadcast %cst_77 : f32 to vector<16x256xf32>
    %80 = arith.maximumf %78, %79 : vector<16x256xf32>
    %c0_78 = arith.constant 0 : index
    %c128_79 = arith.constant 128 : index
    %81 = vector.load %arg12[%c0_78, %c128_79] : memref<16x512xf32, #tpu.memory_space<vmem>>, vector<16x256xf32>
    tpu.vector_store %arg12[%c0_78, %c128_79], %80 {strides = array<i32>} : memref<16x512xf32, #tpu.memory_space<vmem>>, vector<16x256xf32>,
    %c0_80 = arith.constant 0 : index
    %c111_81 = arith.constant 111 : index
    %82 = vector.load %arg12[%c0_80, %c111_81] : memref<16x512xf32, #tpu.memory_space<vmem>>, vector<16x256xf32>
    %c0_82 = arith.constant 0 : index
    %c0_83 = arith.constant 0 : index
    %c0_84 = arith.constant 0 : index
    %83 = vector.load %arg1[%c0_82, %c0_83, %c0_84] : memref<3x1x256xf32, #tpu.memory_space<vmem>>, vector<1x1x256xf32>
    %84 = vector.shape_cast %83 : vector<1x1x256xf32> to vector<1x256xf32>
    %85 = vector.broadcast %84 : vector<1x256xf32> to vector<16x256xf32>
    %86 = arith.mulf %82, %85 : vector<16x256xf32>
    %c0_85 = arith.constant 0 : index
    %c0_86 = arith.constant 0 : index
    %87 = vector.load %arg13[%c0_85, %c0_86] : memref<144x256xf32, #tpu.memory_space<vmem>>, vector<16x256xf32>
    tpu.vector_store %arg13[%c0_85, %c0_86], %86 {strides = array<i32>} : memref<144x256xf32, #tpu.memory_space<vmem>>, vector<16x256xf32>,
    %c0_87 = arith.constant 0 : index
    %c112_88 = arith.constant 112 : index
    %88 = vector.load %arg12[%c0_87, %c112_88] : memref<16x512xf32, #tpu.memory_space<vmem>>, vector<16x256xf32>
    %c16_89 = arith.constant 16 : index
    %c0_90 = arith.constant 0 : index
    %89 = vector.load %arg13[%c16_89, %c0_90] : memref<144x256xf32, #tpu.memory_space<vmem>>, vector<16x256xf32>
    tpu.vector_store %arg13[%c16_89, %c0_90], %88 {strides = array<i32>} : memref<144x256xf32, #tpu.memory_space<vmem>>, vector<16x256xf32>,
    %c0_91 = arith.constant 0 : index
    %c113_92 = arith.constant 113 : index
    %90 = vector.load %arg12[%c0_91, %c113_92] : memref<16x512xf32, #tpu.memory_space<vmem>>, vector<16x256xf32>
    %c2_93 = arith.constant 2 : index
    %c0_94 = arith.constant 0 : index
    %c0_95 = arith.constant 0 : index
    %91 = vector.load %arg1[%c2_93, %c0_94, %c0_95] : memref<3x1x256xf32, #tpu.memory_space<vmem>>, vector<1x1x256xf32>
    %92 = vector.shape_cast %91 : vector<1x1x256xf32> to vector<1x256xf32>
    %93 = vector.broadcast %92 : vector<1x256xf32> to vector<16x256xf32>
    %94 = arith.mulf %90, %93 : vector<16x256xf32>
    %c32_96 = arith.constant 32 : index
    %c0_97 = arith.constant 0 : index
    %95 = vector.load %arg13[%c32_96, %c0_97] : memref<144x256xf32, #tpu.memory_space<vmem>>, vector<16x256xf32>
    tpu.vector_store %arg13[%c32_96, %c0_97], %94 {strides = array<i32>} : memref<144x256xf32, #tpu.memory_space<vmem>>, vector<16x256xf32>,
    %c0_98 = arith.constant 0 : index
    %c127_99 = arith.constant 127 : index
    %96 = vector.load %arg12[%c0_98, %c127_99] : memref<16x512xf32, #tpu.memory_space<vmem>>, vector<16x256xf32>
    %c0_100 = arith.constant 0 : index
    %c0_101 = arith.constant 0 : index
    %c0_102 = arith.constant 0 : index
    %97 = vector.load %arg1[%c0_100, %c0_101, %c0_102] : memref<3x1x256xf32, #tpu.memory_space<vmem>>, vector<1x1x256xf32>
    %98 = vector.shape_cast %97 : vector<1x1x256xf32> to vector<1x256xf32>
    %99 = vector.broadcast %98 : vector<1x256xf32> to vector<16x256xf32>
    %100 = arith.mulf %96, %99 : vector<16x256xf32>
    %c48_103 = arith.constant 48 : index
    %c0_104 = arith.constant 0 : index
    %101 = vector.load %arg13[%c48_103, %c0_104] : memref<144x256xf32, #tpu.memory_space<vmem>>, vector<16x256xf32>
    tpu.vector_store %arg13[%c48_103, %c0_104], %100 {strides = array<i32>} : memref<144x256xf32, #tpu.memory_space<vmem>>, vector<16x256xf32>,
    %c0_105 = arith.constant 0 : index
    %c128_106 = arith.constant 128 : index
    %102 = vector.load %arg12[%c0_105, %c128_106] : memref<16x512xf32, #tpu.memory_space<vmem>>, vector<16x256xf32>
    %c64_107 = arith.constant 64 : index
    %c0_108 = arith.constant 0 : index
    %103 = vector.load %arg13[%c64_107, %c0_108] : memref<144x256xf32, #tpu.memory_space<vmem>>, vector<16x256xf32>
    tpu.vector_store %arg13[%c64_107, %c0_108], %102 {strides = array<i32>} : memref<144x256xf32, #tpu.memory_space<vmem>>, vector<16x256xf32>,
    %c0_109 = arith.constant 0 : index
    %c129_110 = arith.constant 129 : index
    %104 = vector.load %arg12[%c0_109, %c129_110] : memref<16x512xf32, #tpu.memory_space<vmem>>, vector<16x256xf32>
    %c2_111 = arith.constant 2 : index
    %c0_112 = arith.constant 0 : index
    %c0_113 = arith.constant 0 : index
    %105 = vector.load %arg1[%c2_111, %c0_112, %c0_113] : memref<3x1x256xf32, #tpu.memory_space<vmem>>, vector<1x1x256xf32>
    %106 = vector.shape_cast %105 : vector<1x1x256xf32> to vector<1x256xf32>
    %107 = vector.broadcast %106 : vector<1x256xf32> to vector<16x256xf32>
    %108 = arith.mulf %104, %107 : vector<16x256xf32>
    %c80 = arith.constant 80 : index
    %c0_114 = arith.constant 0 : index
    %109 = vector.load %arg13[%c80, %c0_114] : memref<144x256xf32, #tpu.memory_space<vmem>>, vector<16x256xf32>
    tpu.vector_store %arg13[%c80, %c0_114], %108 {strides = array<i32>} : memref<144x256xf32, #tpu.memory_space<vmem>>, vector<16x256xf32>,
    %c0_115 = arith.constant 0 : index
    %c143_116 = arith.constant 143 : index
    %110 = vector.load %arg12[%c0_115, %c143_116] : memref<16x512xf32, #tpu.memory_space<vmem>>, vector<16x256xf32>
    %c0_117 = arith.constant 0 : index
    %c0_118 = arith.constant 0 : index
    %c0_119 = arith.constant 0 : index
    %111 = vector.load %arg1[%c0_117, %c0_118, %c0_119] : memref<3x1x256xf32, #tpu.memory_space<vmem>>, vector<1x1x256xf32>
    %112 = vector.shape_cast %111 : vector<1x1x256xf32> to vector<1x256xf32>
    %113 = vector.broadcast %112 : vector<1x256xf32> to vector<16x256xf32>
    %114 = arith.mulf %110, %113 : vector<16x256xf32>
    %c96 = arith.constant 96 : index
    %c0_120 = arith.constant 0 : index
    %115 = vector.load %arg13[%c96, %c0_120] : memref<144x256xf32, #tpu.memory_space<vmem>>, vector<16x256xf32>
    tpu.vector_store %arg13[%c96, %c0_120], %114 {strides = array<i32>} : memref<144x256xf32, #tpu.memory_space<vmem>>, vector<16x256xf32>,
    %c0_121 = arith.constant 0 : index
    %c144_122 = arith.constant 144 : index
    %116 = vector.load %arg12[%c0_121, %c144_122] : memref<16x512xf32, #tpu.memory_space<vmem>>, vector<16x256xf32>
    %c112_123 = arith.constant 112 : index
    %c0_124 = arith.constant 0 : index
    %117 = vector.load %arg13[%c112_123, %c0_124] : memref<144x256xf32, #tpu.memory_space<vmem>>, vector<16x256xf32>
    tpu.vector_store %arg13[%c112_123, %c0_124], %116 {strides = array<i32>} : memref<144x256xf32, #tpu.memory_space<vmem>>, vector<16x256xf32>,
    %c0_125 = arith.constant 0 : index
    %c145_126 = arith.constant 145 : index
    %118 = vector.load %arg12[%c0_125, %c145_126] : memref<16x512xf32, #tpu.memory_space<vmem>>, vector<16x256xf32>
    %c2_127 = arith.constant 2 : index
    %c0_128 = arith.constant 0 : index
    %c0_129 = arith.constant 0 : index
    %119 = vector.load %arg1[%c2_127, %c0_128, %c0_129] : memref<3x1x256xf32, #tpu.memory_space<vmem>>, vector<1x1x256xf32>
    %120 = vector.shape_cast %119 : vector<1x1x256xf32> to vector<1x256xf32>
    %121 = vector.broadcast %120 : vector<1x256xf32> to vector<16x256xf32>
    %122 = arith.mulf %118, %121 : vector<16x256xf32>
    %c128_130 = arith.constant 128 : index
    %c0_131 = arith.constant 0 : index
    %123 = vector.load %arg13[%c128_130, %c0_131] : memref<144x256xf32, #tpu.memory_space<vmem>>, vector<16x256xf32>
    tpu.vector_store %arg13[%c128_130, %c0_131], %122 {strides = array<i32>} : memref<144x256xf32, #tpu.memory_space<vmem>>, vector<16x256xf32>,
    %c0_132 = arith.constant 0 : index
    %c0_133 = arith.constant 0 : index
    %124 = vector.load %arg13[%c0_132, %c0_133] : memref<144x256xf32, #tpu.memory_space<vmem>>, vector<144x256xf32>
    %cst_134 = arith.constant dense<0.000000e+00> : vector<8x256xf32>
    %125 = tpu.matmul %72, %124, %cst_134 {dimension_numbers = #tpu.dot_dimension_numbers<[1], [0], [0], [1], [0, 0, 1, 1], [], []>} : vector<8x144xf32>, vector<144x256xf32>, vector<8x256xf32> -> vector<8x256xf32>
    %126 = vector.broadcast %73 : vector<8x1xf32> to vector<8x256xf32>
    %127 = arith.addf %125, %126 : vector<8x256xf32>
    %cst_135 = arith.constant 0.000000e+00 : f32
    %128 = vector.broadcast %cst_135 : f32 to vector<8x256xf32>
    %129 = arith.maximumf %127, %128 : vector<8x256xf32>
    %c0_136 = arith.constant 0 : index
    %c16_137 = arith.constant 16 : index
    %c0_138 = arith.constant 0 : index
    %130 = vector.load %arg11[%c0_136, %c16_137, %c0_138] : memref<1x24x256xf32, #tpu.memory_space<vmem>>, vector<1x8x256xf32>
    %131 = vector.shape_cast %130 : vector<1x8x256xf32> to vector<8x256xf32>
    %132 = vector.shape_cast %129 : vector<8x256xf32> to vector<1x8x256xf32>
    tpu.vector_store %arg11[%c0_136, %c16_137, %c0_138], %132 {strides = array<i32>} : memref<1x24x256xf32, #tpu.memory_space<vmem>>, vector<1x8x256xf32>,
    return
  }
  func.func @transform_0(%arg0: i32) -> (i32, i32, i32) {
    %c0_i32 = arith.constant 0 : i32
    %c0_i32_0 = arith.constant 0 : i32
    %c0_i32_1 = arith.constant 0 : i32
    %c0_i32_2 = arith.constant 0 : i32
    return %c0_i32, %c0_i32_0, %c0_i32_1 : i32, i32, i32
  }
  func.func @transform_1(%arg0: i32) -> (i32, i32, i32) {
    %c0_i32 = arith.constant 0 : i32
    %c0_i32_0 = arith.constant 0 : i32
    %c0_i32_1 = arith.constant 0 : i32
    return %arg0, %c0_i32, %c0_i32_0 : i32, i32, i32
  }
  func.func @transform_2(%arg0: i32) -> (i32, i32) {
    %c0_i32 = arith.constant 0 : i32
    %c0_i32_0 = arith.constant 0 : i32
    %c0_i32_1 = arith.constant 0 : i32
    return %c0_i32, %c0_i32_0 : i32, i32
  }
  func.func @transform_3(%arg0: i32) -> (i32, i32) {
    %c0_i32 = arith.constant 0 : i32
    %c0_i32_0 = arith.constant 0 : i32
    %c0_i32_1 = arith.constant 0 : i32
    return %c0_i32, %c0_i32_0 : i32, i32
  }
  func.func @transform_4(%arg0: i32) -> (i32, i32) {
    %c0_i32 = arith.constant 0 : i32
    %c0_i32_0 = arith.constant 0 : i32
    %c0_i32_1 = arith.constant 0 : i32
    return %c0_i32, %c0_i32_0 : i32, i32
  }
  func.func @transform_5(%arg0: i32) -> (i32, i32) {
    %c0_i32 = arith.constant 0 : i32
    %c0_i32_0 = arith.constant 0 : i32
    %c0_i32_1 = arith.constant 0 : i32
    return %c0_i32, %c0_i32_0 : i32, i32
  }
  func.func @transform_6(%arg0: i32) -> (i32, i32) {
    %c0_i32 = arith.constant 0 : i32
    %c0_i32_0 = arith.constant 0 : i32
    %c0_i32_1 = arith.constant 0 : i32
    return %c0_i32, %c0_i32_0 : i32, i32
  }
  func.func @transform_7(%arg0: i32) -> (i32, i32) {
    %c0_i32 = arith.constant 0 : i32
    %c0_i32_0 = arith.constant 0 : i32
    %c0_i32_1 = arith.constant 0 : i32
    return %c0_i32, %c0_i32_0 : i32, i32
  }
  func.func @transform_8(%arg0: i32) -> (i32, i32) {
    %c0_i32 = arith.constant 0 : i32
    %c0_i32_0 = arith.constant 0 : i32
    %c0_i32_1 = arith.constant 0 : i32
    return %c0_i32, %c0_i32_0 : i32, i32
  }
  func.func @transform_9(%arg0: i32) -> (i32, i32) {
    %c0_i32 = arith.constant 0 : i32
    %c0_i32_0 = arith.constant 0 : i32
    %c0_i32_1 = arith.constant 0 : i32
    return %c0_i32, %c0_i32_0 : i32, i32
  }
  func.func @transform_10(%arg0: i32) -> (i32, i32, i32) {
    %c0_i32 = arith.constant 0 : i32
    %c0_i32_0 = arith.constant 0 : i32
    %c0_i32_1 = arith.constant 0 : i32
    return %arg0, %c0_i32, %c0_i32_0 : i32, i32, i32
  }
}

</mosaic_0001>

<bundles_post_ra>
// kernel: tpu_custom_call.1
= control target key start
LH: loop header
LB: loop body
LE: loop exit
PB: predicated region body
PF: predicated region fallthrough
CT: control target
= control target key end

     0   :  { %s2698_s0 = inlined_call_operand.hbm [shape: f32[3,1,256], index: 0, kind: input, shape index: {}]   ;;  %s2699_s1 = inlined_call_operand.vmem [shape: f32[2,8,256], index: 1, kind: input, shape index: {}]   ;;  %s2700_s2 = inlined_call_operand.hbm [shape: f32[8,8], index: 2, kind: input, shape index: {}]   ;;  %s2701_s3 = inlined_call_operand.vmem [shape: f32[8,1], index: 3, kind: input, shape index: {}]   ;;  %s2702_s4 = inlined_call_operand.hbm [shape: f32[8,72], index: 4, kind: input, shape index: {}]   ;;  %s2703_s5 = inlined_call_operand.vmem [shape: f32[8,1], index: 5, kind: input, shape index: {}]   ;;  %s2704_s6 = inlined_call_operand.vmem [shape: f32[16,16], index: 6, kind: input, shape index: {}]   ;;  %s2705_s7 = inlined_call_operand.vmem [shape: f32[16,1], index: 7, kind: input, shape index: {}]   ;;  %s2706_s8 = inlined_call_operand.vmem [shape: f32[8,144], index: 8, kind: input, shape index: {}]   ;;  %s2707_s9 = inlined_call_operand.vmem [shape: f32[8,1], index: 9, kind: input, shape index: {}]   ;;  %s2708_s10 = inlined_call_operand.hbm [shape: f32[2,24,256], index: 10, kind: output, shape index: {}]  }
   0x1   :  { %2716 = sst [smem:[#allocation18_spill]] %s2700_s2 }
   0x2   :  { %15 = vsyncpa [#allocation5], 0 }
   0x3   :  { %16 = vsyncpa [#allocation8], 0 }
   0x4   :  { %17 = vsyncpa [#allocation6], 0 }
   0x5   :  { %19 = vsyncpa [#allocation6 + $0x1], 0  ;;  %s2210_s13 = smov 0   ;;  %s2212_s14 = smov 0  }
   0x6   :  { %s2214_s15 = smov 0   ;;  %s2216_s16 = smov 0  }
   0x7 LB: > { %2717 = sst [smem:[#allocation14_spill]] %s2132_s15  ;;  %s2231_s17 = sadd.s32 4294967295, %s2136_s16   ;;  %s2136_s16 = sphi %s2216_s16, %s2735_s16   ;;  %s2132_s15 = sphi %s2214_s15, %s2737_s15   ;;  %s2128_s14 = sphi %s2212_s14, %s2739_s14   ;;  %s2124_s13 = sphi %s2210_s13, %s2738_s13  }
   0x8   : > { %s1663_s18 = sadd.s32 4294967294, %s2136_s16   ;;  %s2235_s19 = sadd.s32 1, %s2136_s16  }
   0x9   : > { %2718 = sst [smem:[#allocation15_spill]] %s2235_s19  ;;  %s247_s20 = sadd.s32 1, %s2132_s15 }
   0xa   : > { %s244_s21 = ssub.s32 %s2136_s16, %s2235_s19  ;;  %p257_p0 = scmp.ne.s32.totalorder %s2132_s15, %s2128_s14 }
   0xb   : > { %p245_p1 = scmp.eq.s32.totalorder %s244_s21, 0  ;;  %p258_p2 = scmp.eq.s32.totalorder %s2231_s17, 1 }
   0xc   : > { %p263_p3 = scmp.ne.s32.totalorder %s2128_s14, %s2124_s13  ;;  %p264_p4 = scmp.eq.s32.totalorder %s1663_s18, 1 }
   0xd   : > { %s2246_s22 = scalar_select %p245_p1, %s2132_s15, %s247_s20  }
   0xe   : > { %p2248_p5 = por %p258_p2, %p257_p0  ;;  %p2252_p6 = por %p264_p4, %p263_p3 }
   0xf   : > { %2719 = sst [smem:[#allocation16_spill]] %s2246_s22  ;;  %p1664_p7 = scmp.ge.s32.totalorder %s2136_s16, 1 }
  0x10   : > { %s2720_s23 = scalar_select %p2248_p5, 1, 0 }
  0x11   : > { %s2721_s24 = scalar_select %p2252_p6, 1, 0 }
  0x12   : > { %p271_p8 = scmp.lt.s32.totalorder %s2136_s16, 3  ;;  %p2710_p9 = scmp.eq.s32.totalorder %s2231_s17, 0 }
  0x13   : > { %2722 = sst [smem:[#allocation17_spill]] %s2721_s24  ;;  %s2138_s26 = smov [#allocation7]  }
  0x14   : > { %p2259_p10 = pnand %p1664_p7, %p271_p8  ;;  %s297_s27 = sshll.u32 %s2138_s26, 4  ;;  %s298_s27 = int_to_ptr.vmem [resolvable:$true] %s297_s27 }
  0x15   : > { %s2139_s28 = smov [#allocation4]   ;;  %s2140_s11 = smov [#allocation9]  }
  0x16   : > { %s2723_s25 = scalar_select %p2259_p10, 1, 0 }
  0x17   : > { %p1756_p11 = pneg %p2259_p10  ;;  %s283_s29 = sshll.u32 %s2139_s28, 4  ;;  %s2271_s29 = int_to_ptr.vmem [resolvable:$true] %s283_s29 }
  0x18   : > { %s2273_s12 = sshll.u32 %s2140_s11, 4  ;;  %s2725_s2 = sld [smem:[#allocation18_spill]]  ;;  %s312_s12 = int_to_ptr.vmem [resolvable:$true] %s2273_s12 }
  0x19   : > { %p2267_p12 = pnand %p2710_p9, %p1756_p11 }
  0x1b   : > { %p2283_p0 = pneg %p2267_p12 }
  0x1e   : > { %s1982_s21 = scalar_lea.hbm %s2725_s2, 128 }
  0x1f   : > { %p1983_p13 = scmp.ne.s32.totalorder %s2725_s2, %s1982_s21  ;;  %p1989_p3 = scmp.lt.u32.totalorder %s1982_s21, %s2725_s2 }
  0x21   : > { %p1985_p1 = pnand %p2283_p0, %p1983_p13 }
  0x23   : > { %p1986_p2 = pneg %p1985_p1 }
  0x25   : > { %p1991_p4 = pnand %p1989_p3, %p1986_p2 }
  0x27   : > { %1994 = shalt.err (!%p1991_p4)
}
  0x28   : > { %s1995_s18 = scalar_lea.vmem %s298_s27, 128  ;;  %p2003_p9 = scmp.lt.s32.totalorder %s298_s27, %s298_s27 }
  0x29   : > { %p1996_p7 = scmp.ne.s32.totalorder %s298_s27, %s1995_s18  ;;  %p2004_p6 = scmp.lt.s32.totalorder %s1995_s18, %s1995_s18 }
  0x2b   : > { %p1998_p8 = pnand %p1996_p7, %p2283_p0  ;;  %p2005_p5 = por %p2004_p6, %p2003_p9 }
  0x2d   : > { %p1999_p11 = pneg %p1998_p8 }
  0x2f   : > { %p2006_p10 = pnand %p2005_p5, %p1999_p11 }
  0x31   : > { %2009 = shalt.err (!%p2006_p10)
}
  0x32   : > { %1762 = dma.hbm_to_vmem [thread:$0]  (!%p2267_p12), %s2725_s2, 128, %s298_s27, [#allocation8]  }
  0x33   : > { %s2010_s26 = scalar_lea.hbm %s2698_s0, 96 }
  0x34   : > { %p2011_p13 = scmp.ne.s32.totalorder %s2698_s0, %s2010_s26  ;;  %p2017_p5 = scmp.lt.u32.totalorder %s2010_s26, %s2698_s0 }
  0x36   : > { %p2013_p1 = pnand %p2011_p13, %p2283_p0 }
  0x38   : > { %p2014_p6 = pneg %p2013_p1 }
  0x3a   : > { %p2019_p9 = pnand %p2017_p5, %p2014_p6 }
  0x3c   : > { %2022 = shalt.err (!%p2019_p9)
}
  0x3d   : > { %s2023_s27 = scalar_lea.vmem %s2271_s29, 96  ;;  %p2031_p4 = scmp.lt.s32.totalorder %s2271_s29, %s2271_s29 }
  0x3e   : > { %p2024_p10 = scmp.ne.s32.totalorder %s2271_s29, %s2023_s27  ;;  %p2032_p7 = scmp.lt.s32.totalorder %s2023_s27, %s2023_s27 }
  0x40   : > { %p2026_p2 = pnand %p2024_p10, %p2283_p0  ;;  %p2033_p8 = por %p2032_p7, %p2031_p4 }
  0x42   : > { %p2027_p3 = pneg %p2026_p2 }
  0x44   : > { %p2034_p11 = pnand %p2033_p8, %p2027_p3 }
  0x46   : > { %2037 = shalt.err (!%p2034_p11)
}
  0x47   : > { %s2141_s19 = smov 32   ;;  %s2142_s24 = smov 2  }
  0x48   : > { %1759 = dma.hbm_to_vmem [thread:$0]  (!%p2267_p12), %s2698_s0, 96, %s2271_s29, [#allocation5], %s2141_s19, %s2141_s19, %s2142_s24  }
  0x49   : > { %s2038_s26 = scalar_lea.hbm %s2702_s4, 128 }
  0x4a   : > { %p2039_p13 = scmp.ne.s32.totalorder %s2702_s4, %s2038_s26  ;;  %p2045_p5 = scmp.lt.u32.totalorder %s2038_s26, %s2702_s4 }
  0x4c   : > { %p2041_p1 = pnand %p2039_p13, %p2283_p0 }
  0x4e   : > { %p2042_p6 = pneg %p2041_p1 }
  0x50   : > { %p2047_p9 = pnand %p2045_p5, %p2042_p6 }
  0x52   : > { %2050 = shalt.err (!%p2047_p9)
}
  0x53   : > { %s2051_s22 = scalar_lea.vmem %s312_s12, 128  ;;  %p2059_p4 = scmp.lt.s32.totalorder %s312_s12, %s312_s12 }
  0x54   : > { %p2052_p10 = scmp.ne.s32.totalorder %s312_s12, %s2051_s22  ;;  %p2060_p7 = scmp.lt.s32.totalorder %s2051_s22, %s2051_s22 }
  0x56   : > { %p2054_p2 = pnand %p2052_p10, %p2283_p0  ;;  %p2061_p8 = por %p2060_p7, %p2059_p4 }
  0x58   : > { %p2055_p3 = pneg %p2054_p2 }
  0x5a   : > { %p2062_p11 = pnand %p2061_p8, %p2055_p3 }
  0x5c   : > { %2065 = shalt.err (!%p2062_p11)
}
  0x5d   : > { %1765 = dma.hbm_to_vmem [thread:$0]  (!%p2267_p12), %s2702_s4, 128, %s312_s12, [#allocation8]  }
  0x5e   : > { %p2727_p13 = scmp.ne.s32.totalorder %s2723_s25, 0 }
  0x5f   : > { %p2728_p1 = scmp.eq.s32.totalorder (!%p2727_p13), %s2231_s17, 0 }
  0x60   : > { %347 = sbr.rel (%p2727_p13) target bundleno = 1319 (0x527), region = 60 }
  0x67   : > { %2111 = dma.done.wait (%p2728_p1), [#allocation5], 96   ;;  %p2729_p0 = pmov %p2728_p1 }
  0x69   : > { %2113 = vsyncadd (%p2729_p0), [#allocation5], 4294967200  ;;  %p2730_p6 = pmov %p2729_p0 }
  0x6a   : > { %p2731_p5 = pmov %p2729_p0 }
  0x6b   : > { %2115 = dma.done.wait (%p2730_p6), [#allocation8], 256  }
  0x6c   : > { %2117 = vsyncadd (%p2731_p5), [#allocation8], 4294967040  ;;  %s390_s2 = sand.u32 1, %s2128_s14   ;;  %p393_p12 = scmp.lt.s32.totalorder %s2231_s17, 1  ;;  %v505_v0 = vlaneseq  ;;  %v2143_v1 = vmov 0.0   ;;  %v2144_v2 = vmov 0  }
  0x6d   : > { %489 = vmatprep.mubr.f32.mxu1 %v2143_v1  ;;  %1825 = vset.pattern.permute.xlu0 %v2144_v2  ;;  %s1740_s30 = smul.u32 48, %s390_s2  ;;  %v410_v8 = vld [vmem:[#allocation7] sm:$0xff]  ;;  %vm421_vm0 = vcmask 64512   ;;  %v503_v10 = vld [vmem:[#allocation4] sm:$0x3]  ;;  %s2145_s11 = smov 111  }
  0x6e   : > { %s394_s25 = scalar_select %p393_p12, %s2231_s17, 1  ;;  %v506_v3 = vshrl.u32 %v505_v0, 7  ;;  %1861 = vset.pattern.permute.xlu1 %v2144_v2  ;;  %v411_v9 = vld [vmem:[%s2701_s3] sm:$0xff]  ;;  %vm619_vm1 = vcmask 1039360   ;;  %vm517_vm2 = vcmask 908288   ;;  %vm578_vm3 = vcmask 924672  }
  0x6f   : > { %s2368_s15 = scalar_lea.vmem [#allocation10], %s1740_s30  ;;  %v564_v11 = vld [vmem:[#allocation4 + $0x4] sm:$0x3]  ;;  %418 = vperm.xlu0 %1825, %v411_v9   ;;  %v605_v15 = vld [vmem:[#allocation4] sm:$0x3]  ;;  %s2146_s18 = smov 113  }
  0x70   : > { %s1683_s12 = sshll.u32 %s394_s25, 4  ;;  %v2360_v4 = vsub.s32 0, %v506_v3  ;;  %v2362_v5 = vsub.s32 1, %v506_v3  ;;  %v650_v18 = vld [vmem:[#allocation4 + $0x4] sm:$0x3]  ;;  %s2147_s27 = smov 127  }
  0x71   : > { %s397_s20 = scalar_lea.vmem %s2699_s1, %s1683_s12  ;;  %v689_v21 = vld [vmem:[#allocation4] sm:$0x3]  ;;  %s2148_s22 = smov 1   ;;  %v747_v24 = vld [vmem:[#allocation4 + $0x4] sm:$0x3]  ;;  %vm636_vm4 = vcmask 7168  }
  0x72   : > { %v2364_v6 = vld [vmem:[%s397_s20 + $0x8] sm:$0xff]  ;;  %v2366_v7 = vld [vmem:[%s397_s20] sm:$0xff]  ;;  %v512_v12 = vrot.slane %v503_v10, %v2362_v5  ;;  %v508_v13 = vrot.slane %v503_v10, %v2360_v4  ;;  %v569_v14 = vrot.slane %v564_v11, %v2360_v4  ;;  %v573_v16 = vrot.slane %v564_v11, %v2362_v5  ;;  %s2149_s29 = smov 15   ;;  %s2150_s19 = smov 17  }
  0x73   : > { %409 = vst [vmem:[%s2368_s15 + $0x8] sm:$0xff] %v2364_v6  ;;  %425 = vmatprep.subr.mxu1 %v2364_v6  ;;  %408 = vst [vmem:[%s2368_s15] sm:$0xff] %v2366_v7  ;;  %v610_v17 = vrot.slane %v605_v15, %v2360_v4  ;;  %v614_v19 = vrot.slane %v605_v15, %v2362_v5  ;;  %v655_v20 = vrot.slane %v650_v18, %v2360_v4  ;;  %s2151_s25 = smov 16   ;;  %vm595_vm5 = vcmask 121856   ;;  %s2152_s30 = smov 112  }
  0x74   : > { %426 = vmatpush1.msra.mxu1 %v2366_v7  ;;  %515 = vrot.lane.b32.xlu1 %v512_v12, %s2145_s11  ;;  %v659_v22 = vrot.slane %v650_v18, %v2362_v5  ;;  %v694_v23 = vrot.slane %v689_v21, %v2360_v4  ;;  %v698_v25 = vrot.slane %v689_v21, %v2362_v5  ;;  %vm534_vm6 = vcmask 138240   ;;  %v413_v18 = vld [vmem:[%s2703_s5] sm:$0xff]  ;;  %s1570_s21 = sshll.u32 %s2368_s15, 4  ;;  %p2732_p10 = scmp.ne.s32.totalorder %s2720_s23, 0  ;;  %s2650_s21 = int_to_ptr.vmem [resolvable:$true] %s1570_s21 }
  0x75   : > { %1675 = vmatmul.mubr.msk.f32.vlgmr.msra.gmra.mrb[0].mxu1 %vm421_vm0, %v410_v8  ;;  %513 = vrot.lane.b32.xlu0 %v508_v13, %s2145_s11  ;;  %v752_v26 = vrot.slane %v747_v24, %v2360_v4  ;;  %v756_v27 = vrot.slane %v747_v24, %v2362_v5  ;;  %vm553_vm7 = vcmask 130048   ;;  %vm737_vm8 = vcmask 916480   ;;  %s2066_s24 = scalar_lea.vmem %s2650_s21, 768  ;;  %s2153_s20 = smov [#allocation10]  }
  0x76   : > { %874 = vmatprep.mubr.f32.mxu1 %v2143_v1  ;;  %vm806_vm9 = vcmask 588800   ;;  %p2067_p9 = scmp.ne.s32.totalorder %s2650_s21, %s2066_s24 }
  0x78   : > { %574 = vrot.lane.b32.xlu1 %v569_v14, %s2146_s18  ;;  %p2068_p2 = pnand %p2067_p9, %p2732_p10 }
  0x79   : > { %576 = vrot.lane.b32.xlu0 %v573_v16, %s2146_s18 }
  0x7a   : > { %p2069_p3 = pneg %p2068_p2 }
  0x7c   : > { %615 = vrot.lane.b32.xlu1 %v610_v17, %s2147_s27 }
  0x7d   : > { %617 = vrot.lane.b32.xlu0 %v614_v19, %s2147_s27 }
  0x80   : > { %660 = vrot.lane.b32.xlu1 %v655_v20, %s2148_s22  ;;  %v888_v20 = vld [vmem:[%s2705_s7 + $0x8] sm:$0xff] }
  0x81   : > { %662 = vrot.lane.b32.xlu0 %v659_v22, %s2148_s22 }
  0x84   : > { %699 = vrot.lane.b32.xlu1 %v694_v23, %s2149_s29 }
  0x85   : > { %701 = vrot.lane.b32.xlu0 %v698_v25, %s2149_s29 }
  0x88   : > { %757 = vrot.lane.b32.xlu1 %v752_v26, %s2150_s19 }
  0x89   : > { %759 = vrot.lane.b32.xlu0 %v756_v27, %s2150_s19 }
  0x8d   : > { %547 = vrot.lane.b32.xlu0 %v2143_v1, %s2151_s25 }
  0xe6   : > { %v516_v28 = vpop.permute.xlu1 %515 }
  0xea   : > { %v575_v29 = vpop.permute.xlu1 %574 }
  0xeb   : > { %v583_v35 = vmul.f32 0.0, %v575_v29 }
  0xee   : > { %v616_v30 = vpop.permute.xlu1 %615  ;;  %v419_v32 = vpop.permute.xlu0 %418 }
  0xef   : > { %v624_v31 = vmul.f32 0.0, %v616_v30 }
  0xf1   : > { %630 = vrot.lane.b32.xlu0 %v624_v31, %s2148_s22 }
  0xf2   : > { %v514_v33 = vpop.permute.xlu0 %513  ;;  %v661_v55 = vpop.permute.xlu1 %660 }
  0xf3   : > { %v522_v34 = vmul.f32 0.0, %v514_v33  ;;  %v518_v44 = vsel %vm517_vm2, %v514_v33, %v516_v28 }
  0xf5   : > { %528 = vrot.lane.b32.xlu1 %v522_v34, %s2150_s19 }
  0xf6   : > { %v577_v36 = vpop.permute.xlu0 %576  ;;  %v700_v61 = vpop.permute.xlu1 %699 }
  0xf7   : > { %v579_v46 = vsel %vm578_vm3, %v575_v29, %v577_v36 }
  0xf9   : > { %589 = vrot.lane.b32.xlu1 %v583_v35, %s2149_s29 }
  0xfa   : > { %v618_v40 = vpop.permute.xlu0 %617  ;;  %v758_v12 = vpop.permute.xlu1 %757 }
  0xfb   : > { %v620_v42 = vsel %vm619_vm1, %v616_v30, %v618_v40 }
  0xfe   : > { %v663_v56 = vpop.permute.xlu0 %662 }
  0xff   : > { %v664_v59 = vsel %vm636_vm4, %v661_v55, %v663_v56  ;;  %v670_v62 = vmul.f32 0.0, %v663_v56 }
 0x102   : > { %v702_v63 = vpop.permute.xlu0 %701 }
 0x103   : > { %v703_v3 = vsel %vm595_vm5, %v700_v61, %v702_v63  ;;  %v709_v9 = vmul.f32 0.0, %v702_v63 }
 0x106   : > { %v760_v13 = vpop.permute.xlu0 %759 }
 0x107   : > { %v767_v14 = vmul.f32 0.0, %v760_v13  ;;  %v761_v16 = vsel %vm534_vm6, %v758_v12, %v760_v13 }
 0x10a   : > { %v548_v21 = vpop.permute.xlu0 %547 }
 0x148   : > { %v491_v37 = vpop.f32.mrb[0].mxu1 }
 0x149   : > { %v492_v38 = vadd.f32 %v491_v37, %v419_v32  ;;  %v493_v39 = vpop.f32.mrb[1].mxu1 }
 0x14a   : > { %v494_v41 = vadd.f32 %v493_v39, %v419_v32 }
 0x14b   : > { %v2410_v43 = vmax.f32 %v492_v38, 0.0 }
 0x14c   : > { %v2413_v45 = vmax.f32 %v494_v41, 0.0 }
 0x14d   : > { %v523_v47 = vmul.f32 %v518_v44, %v2410_v43  ;;  %v625_v50 = vmul.f32 %v620_v42, %v2410_v43  ;;  %v584_v53 = vmul.f32 %v579_v46, %v2410_v43  ;;  %v668_v60 = vmul.f32 %v661_v55, %v2410_v43 }
 0x14e   : > { %v1826_v48 = vpack.i.bf16 %v2413_v45, %v2410_v43  ;;  %v524_v49 = vmul.f32 %v516_v28, %v2413_v45  ;;  %v626_v51 = vmul.f32 %v618_v40, %v2413_v45  ;;  %v585_v54 = vmul.f32 %v577_v36, %v2413_v45 }
 0x14f   : > { %v707_v0 = vmul.f32 %v700_v61, %v2410_v43  ;;  %v669_v2 = vmul.f32 %v664_v59, %v2413_v45  ;;  %v1846_v8 = vpack.i.bf16 %v2143_v1, %v2413_v45  ;;  %v708_v11 = vmul.f32 %v703_v3, %v2413_v45 }
 0x150   : > { %1827 = vrot.lane.b32.xlu0 %v1826_v48, %s2151_s25  ;;  %v1831_v52 = vpack.i.bf16 %v524_v49, %v523_v47  ;;  %v1841_v57 = vpack.i.bf16 %v626_v51, %v625_v50  ;;  %v1836_v58 = vpack.i.bf16 %v585_v54, %v584_v53  ;;  %v766_v17 = vmul.f32 %v761_v16, %v2413_v45 }
 0x151   : > { %v1851_v10 = vpack.i.bf16 %v670_v62, %v669_v2  ;;  %v1856_v15 = vpack.i.bf16 %v709_v9, %v708_v11  ;;  %v765_v19 = vmul.f32 %v758_v12, %v2410_v43 }
 0x152   : > { %1832 = vrot.lane.b32.xlu1 %v1831_v52, %s2150_s19 }
 0x154   : > { %1842 = vrot.lane.b32.xlu0 %v1841_v57, %s2148_s22 }
 0x156   : > { %1837 = vrot.lane.b32.xlu1 %v1836_v58, %s2149_s29 }
 0x158   : > { %674 = vrot.lane.b32.xlu0 %v668_v60, %s2147_s27 }
 0x15a   : > { %713 = vrot.lane.b32.xlu1 %v707_v0, %s2146_s18 }
 0x15c   : > { %1847 = vrot.lane.b32.xlu0 %v1846_v8, %s2152_s30 }
 0x15e   : > { %1852 = vrot.lane.b32.xlu1 %v1851_v10, %s2147_s27 }
 0x160   : > { %731 = vrot.lane.b32.xlu0 %v2410_v43, %s2152_s30 }
 0x162   : > { %1857 = vrot.lane.b32.xlu1 %v1856_v15, %s2146_s18 }
 0x163   : > { %v631_v23 = vpop.permute.xlu0 %630 }
 0x164   : > { %775 = vrot.lane.b32.xlu0 %v767_v14, %s2145_s11 }
 0x166   : > { %773 = vrot.lane.b32.xlu1 %v766_v17, %s2145_s11  ;;  %v412_v17 = vld [vmem:[#allocation9] sm:$0xff] }
 0x167   : > { %v529_v22 = vpop.permute.xlu1 %528 }
 0x168   : > { %803 = vperm.xlu0 %1825, %v413_v18   ;;  %v887_v18 = vld [vmem:[%s2705_s7] sm:$0xff] }
 0x16a   : > { %771 = vrot.lane.b32.xlu1 %v765_v19, %s2145_s11  ;;  %v1003_v19 = vld [vmem:[#allocation4] sm:$0x3] }
 0x16b   : > { %v590_v24 = vpop.permute.xlu1 %589 }
 0x16c   : > { %903 = vperm.xlu0 %1825, %v888_v20   ;;  %v1099_v20 = vld [vmem:[#allocation4 + $0x4] sm:$0x3] }
 0x16e   : > { %898 = vperm.xlu1 %1861, %v887_v18  }
 0x1c2   : > { %v1828_v25 = vpop.permute.xlu0 %1827 }
 0x1c3   : > { %v1830_v26 = vunpack.i.h.bf16 %v1828_v25  ;;  %v1829_v27 = vunpack.i.l.bf16 %v1828_v25  ;;  %v1104_v25 = vrot.slane %v1099_v20, %v2360_v4 }
 0x1c4   : > { %v1833_v28 = vpop.permute.xlu1 %1832 }
 0x1c5   : > { %v1835_v29 = vunpack.i.h.bf16 %v1833_v28  ;;  %v1834_v30 = vunpack.i.l.bf16 %v1833_v28  ;;  %v554_v31 = vsel %vm553_vm7, %v548_v21, %v1829_v27  ;;  %v555_v33 = vsel %vm553_vm7, %v1829_v27, %v1830_v26  ;;  %v1227_v27 = vld [vmem:[#allocation4 + $0x4] sm:$0x3] }
 0x1c6   : > { %v1843_v32 = vpop.permute.xlu0 %1842  ;;  %v1012_v21 = vrot.slane %v1003_v19, %v2362_v5 }
 0x1c7   : > { %v535_v34 = vsel %vm534_vm6, %v529_v22, %v1834_v30  ;;  %v1845_v35 = vunpack.i.h.bf16 %v1843_v32  ;;  %v1844_v36 = vunpack.i.l.bf16 %v1843_v32  ;;  %v536_v37 = vsel %vm534_vm6, %v1834_v30, %v1835_v29  ;;  %v1287_v30 = vld [vmem:[#allocation4] sm:$0x3] }
 0x1c8   : > { %v1686_v38 = vpack.c.bf16 %v554_v31, %v535_v34  ;;  %v1838_v39 = vpop.permute.xlu1 %1837  ;;  %v1684_v40 = vpack.c.bf16 %v555_v33, %v536_v37  ;;  %v1008_v22 = vrot.slane %v1003_v19, %v2360_v4  ;;  %1015 = vrot.lane.b32.xlu0 %v1012_v21, %s2145_s11  ;;  %v1236_v29 = vrot.slane %v1227_v27, %v2362_v5  ;;  %v1383_v33 = vld [vmem:[#allocation4 + $0x4] sm:$0x3] }
 0x1c9   : > { %v1840_v41 = vunpack.i.h.bf16 %v1838_v39  ;;  %v1839_v42 = vunpack.i.l.bf16 %v1838_v39  ;;  %v637_v46 = vsel %vm636_vm4, %v631_v23, %v1844_v36  ;;  %v638_v49 = vsel %vm636_vm4, %v1844_v36, %v1845_v35 }
 0x1ca   : > { %v675_v44 = vpop.permute.xlu0 %674  ;;  %1685 = vmatprep.subr.bf16.mxu1 %v1684_v40  ;;  %v1108_v23 = vrot.slane %v1099_v20, %v2362_v5  ;;  %1013 = vrot.lane.b32.xlu1 %v1008_v22, %s2145_s11  ;;  %v1232_v31 = vrot.slane %v1227_v27, %v2360_v4  ;;  %v1296_v32 = vrot.slane %v1287_v30, %v2362_v5 }
 0x1cb   : > { %v596_v47 = vsel %vm595_vm5, %v590_v24, %v1839_v42  ;;  %1687 = vmatpush1.bf16.msra.mxu1 %v1686_v38  ;;  %v597_v48 = vsel %vm595_vm5, %v1839_v42, %v1840_v41  ;;  %v1159_v24 = vld [vmem:[#allocation4] sm:$0x3]  ;;  %v1292_v34 = vrot.slane %v1287_v30, %v2360_v4  ;;  %v1392_v35 = vrot.slane %v1383_v33, %v2362_v5 }
 0x1cc   : > { %v1690_v50 = vpack.c.bf16 %v637_v46, %v596_v47  ;;  %v714_v51 = vpop.permute.xlu1 %713  ;;  %v1688_v52 = vpack.c.bf16 %v638_v49, %v597_v48  ;;  %1111 = vrot.lane.b32.xlu0 %v1108_v23, %s2146_s18  ;;  %v1168_v26 = vrot.slane %v1159_v24, %v2362_v5  ;;  %v1164_v28 = vrot.slane %v1159_v24, %v2360_v4  ;;  %v886_v47 = vld [vmem:[%s2704_s6 + $0x8] sm:$0xff] }
 0x1cd   : > { %v1388_v36 = vrot.slane %v1383_v33, %v2360_v4  ;;  %v885_v4 = vld [vmem:[%s2704_s6] sm:$0xff] }
 0x1ce   : > { %v1848_v53 = vpop.permute.xlu0 %1847  ;;  %1689 = vmatprep.subr.bf16.mxu1 %v1688_v52  ;;  %1109 = vrot.lane.b32.xlu1 %v1104_v25, %s2146_s18 }
 0x1cf   : > { %1691 = vmatpush1.bf16.msra.mxu1 %v1690_v50  ;;  %v1850_v57 = vunpack.i.h.bf16 %v1848_v53  ;;  %v1849_v58 = vunpack.i.l.bf16 %v1848_v53 }
 0x1d0   : > { %v1853_v54 = vpop.permute.xlu1 %1852  ;;  %1171 = vrot.lane.b32.xlu0 %v1168_v26, %s2147_s27 }
 0x1d1   : > { %v1855_v55 = vunpack.i.h.bf16 %v1853_v54  ;;  %v1854_v56 = vunpack.i.l.bf16 %v1853_v54  ;;  %v739_v11 = vsel %vm737_vm8, %v1849_v58, %v1850_v57 }
 0x1d2   : > { %v732_v62 = vpop.permute.xlu0 %731  ;;  %1169 = vrot.lane.b32.xlu1 %v1164_v28, %s2147_s27 }
 0x1d3   : > { %v680_v59 = vsel %vm619_vm1, %v675_v44, %v1854_v56  ;;  %v681_v60 = vsel %vm619_vm1, %v1854_v56, %v1855_v55  ;;  %v738_v8 = vsel %vm737_vm8, %v732_v62, %v1849_v58 }
 0x1d4   : > { %v1694_v61 = vpack.c.bf16 %v680_v59, %v2410_v43  ;;  %v1858_v63 = vpop.permute.xlu1 %1857  ;;  %v1692_v0 = vpack.c.bf16 %v681_v60, %v2413_v45  ;;  %1239 = vrot.lane.b32.xlu0 %v1236_v29, %s2148_s22 }
 0x1d5   : > { %v1860_v2 = vunpack.i.h.bf16 %v1858_v63  ;;  %v1859_v3 = vunpack.i.l.bf16 %v1858_v63 }
 0x1d6   : > { %1693 = vmatprep.subr.bf16.mxu1 %v1692_v0  ;;  %v776_v13 = vpop.permute.xlu0 %775  ;;  %1237 = vrot.lane.b32.xlu1 %v1232_v31, %s2148_s22 }
 0x1d7   : > { %v719_v9 = vsel %vm578_vm3, %v714_v51, %v1859_v3  ;;  %1695 = vmatpush1.bf16.msra.mxu1 %v1694_v61  ;;  %v720_v10 = vsel %vm578_vm3, %v1859_v3, %v1860_v2 }
 0x1d8   : > { %v1698_v12 = vpack.c.bf16 %v738_v8, %v719_v9  ;;  %v774_v43 = vpop.permute.xlu1 %773  ;;  %v1696_v14 = vpack.c.bf16 %v739_v11, %v720_v10  ;;  %1299 = vrot.lane.b32.xlu0 %v1296_v32, %s2149_s29 }
 0x1d9   : > { %v778_v45 = vsel %vm517_vm2, %v774_v43, %v776_v13 }
 0x1da   : > { %1697 = vmatprep.subr.bf16.mxu1 %v1696_v14  ;;  %1297 = vrot.lane.b32.xlu1 %v1292_v34, %s2149_s29 }
 0x1db   : > { %1699 = vmatpush1.bf16.msra.mxu1 %v1698_v12 }
 0x1dc   : > { %v772_v15 = vpop.permute.xlu1 %771  ;;  %826 = vmatprep.subr.mxu1 %v778_v45  ;;  %1395 = vrot.lane.b32.xlu0 %v1392_v35, %s2150_s19 }
 0x1dd   : > { %v777_v16 = vsel %vm517_vm2, %v772_v15, %v774_v43 }
 0x1de   : > { %1393 = vrot.lane.b32.xlu1 %v1388_v36, %s2150_s19 }
 0x1df   : > { %827 = vmatpush1.msra.mxu1 %v777_v16 }
 0x1e0   : > { %1676 = vmatmul.mubr.msk.f32.vlgmr.msra.gmra.mrb[2].mxu1 %vm806_vm9, %v412_v17  ;;  %1868 = vrot.lane.b32.xlu0 %v2143_v1, %s2151_s25 }
 0x1e1   : > { %976 = vmatprep.mubr.f32.mxu1 %v2143_v1 }
 0x1e7   : > { %v804_v37 = vpop.permute.xlu0 %803 }
 0x1eb   : > { %v904_v53 = vpop.permute.xlu0 %903 }
 0x1ed   : > { %v899_v48 = vpop.permute.xlu1 %898 }
 0x23a   : > { %v1016_v54 = vpop.permute.xlu0 %1015 }
 0x23e   : > { %v1112_v56 = vpop.permute.xlu0 %1111 }
 0x242   : > { %v1172_v63 = vpop.permute.xlu0 %1171 }
 0x246   : > { %v1240_v31 = vpop.permute.xlu0 %1239 }
 0x2b3   : > { %v876_v38 = vpop.f32.mrb[2].mxu1 }
 0x2b4   : > { %v877_v39 = vadd.f32 %v876_v38, %v804_v37  ;;  %v878_v40 = vpop.f32.mrb[3].mxu1 }
 0x2b5   : > { %v879_v41 = vadd.f32 %v878_v40, %v804_v37 }
 0x2b6   : > { %v881_v42 = vmax.f32 %v877_v39, 0.0 }
 0x2b7   : > { %v882_v44 = vmax.f32 %v879_v41, 0.0 }
 0x2b8   : > { %883 = vst [vmem:[%s2368_s15 + $0x10] sm:$0xff] %v881_v42  ;;  %v1702_v5 = vpack.c.bf16 %v881_v42, %v2366_v7  ;;  %v1247_v42 = vmul.f32 0.0, %v1240_v31 }
 0x2b9   : > { %884 = vst [vmem:[%s2368_s15 + $0x18] sm:$0xff] %v882_v44  ;;  %v1700_v46 = vpack.c.bf16 %v882_v44, %v2364_v6  ;;  %v1014_v6 = vpop.permute.xlu1 %1013 }
 0x2ba   : > { %v1021_v49 = vmul.f32 0.0, %v1014_v6  ;;  %v1017_v2 = vsel %vm517_vm2, %v1014_v6, %v1016_v54 }
 0x2bb   : > { %1701 = vmatprep.subr.bf16.mxu1 %v1700_v46 }
 0x2bc   : > { %1703 = vmatpush1.bf16.msra.mxu1 %v1702_v5  ;;  %v1862_v7 = vpack.i.bf16 %v1021_v49, %v1021_v49 }
 0x2bd   : > { %v1110_v50 = vpop.permute.xlu1 %1109 }
 0x2be   : > { %v1117_v51 = vmul.f32 0.0, %v1110_v50  ;;  %1863 = vrot.lane.b32.xlu1 %v1862_v7, %s2150_s19  ;;  %v1113_v61 = vsel %vm578_vm3, %v1110_v50, %v1112_v56  ;;  %v1300_v50 = vpop.permute.xlu0 %1299 }
 0x2bf   : > { %1677 = vmatmul.mubr.msk.f32.vlgmr.msra.gmra.mrb[4].mxu1 %vm553_vm7, %v885_v4 }
 0x2c0   : > { %982 = vmatprep.mubr.f32.mxu1 %v2143_v1  ;;  %v1872_v52 = vpack.i.bf16 %v1117_v51, %v1117_v51 }
 0x2c1   : > { %v2518_v55 = vpop.permute.xlu1 %1169 }
 0x2c2   : > { %1873 = vrot.lane.b32.xlu1 %v1872_v52, %s2149_s29  ;;  %v1173_v3 = vsel %vm619_vm1, %v2518_v55, %v1172_v63  ;;  %v1177_v7 = vmul.f32 0.0, %v2518_v55 }
 0x2c3   : > { %1678 = vmatmul.mubr.msk.f32.gmra.mrb[6].mxu1 %vm553_vm7, %v886_v47 }
 0x2c5   : > { %v1238_v58 = vpop.permute.xlu1 %1237 }
 0x2c6   : > { %v1241_v36 = vsel %vm636_vm4, %v1238_v58, %v1240_v31 }
 0x2c9   : > { %v1298_v15 = vpop.permute.xlu1 %1297 }
 0x2ca   : > { %v1301_v52 = vsel %vm595_vm5, %v1298_v15, %v1300_v50 }
 0x2cd   : > { %v1394_v37 = vpop.permute.xlu1 %1393 }
 0x392   : > { %v978_v57 = vpop.f32.mrb[4].mxu1 }
 0x393   : > { %v979_v59 = vadd.f32 %v978_v57, %v899_v48  ;;  %v980_v60 = vpop.f32.mrb[5].mxu1 }
 0x394   : > { %v981_v62 = vadd.f32 %v980_v60, %v899_v48 }
 0x395   : > { %v2521_v0 = vmax.f32 %v979_v59, 0.0 }
 0x396   : > { %v2526_v8 = vmax.f32 %v981_v62, 0.0  ;;  %v984_v9 = vpop.f32.mrb[6].mxu1 }
 0x397   : > { %v985_v10 = vadd.f32 %v984_v9, %v904_v53  ;;  %v986_v11 = vpop.f32.mrb[7].mxu1  ;;  %v1022_v12 = vmul.f32 %v1017_v2, %v2521_v0  ;;  %v1118_v13 = vmul.f32 %v1113_v61, %v2521_v0  ;;  %v1178_v18 = vmul.f32 %v1173_v3, %v2521_v0 }
 0x398   : > { %v987_v43 = vadd.f32 %v986_v11, %v904_v53  ;;  %v1877_v14 = vpack.i.bf16 %v2526_v8, %v2521_v0  ;;  %v1023_v45 = vmul.f32 %v1016_v54, %v2526_v8  ;;  %v1119_v17 = vmul.f32 %v1112_v56, %v2526_v8  ;;  %v890_v11 = vld [vmem:[%s2706_s8 + $0x8] sm:$0xff] }
 0x399   : > { %v2533_v16 = vmax.f32 %v985_v10, 0.0  ;;  %v1179_v19 = vmul.f32 %v1172_v63, %v2526_v8  ;;  %v1245_v34 = vmul.f32 %v1238_v58, %v2521_v0  ;;  %v1305_v39 = vmul.f32 %v1298_v15, %v2521_v0  ;;  %1679 = vmatprep.mubr.msk.f32.mxu0 %vm553_vm7, %v890_v11 }
 0x39a   : > { %v2538_v20 = vmax.f32 %v987_v43, 0.0  ;;  %1878 = vrot.lane.b32.xlu0 %v1877_v14, %s2151_s25  ;;  %v1882_v21 = vpack.i.bf16 %v1023_v45, %v1022_v12  ;;  %v1887_v23 = vpack.i.bf16 %v1119_v17, %v1118_v13  ;;  %v1401_v5 = vmul.f32 %v1394_v37, %v2521_v0  ;;  %v1864_v43 = vpop.permute.xlu1 %1863 }
 0x39b   : > { %v1025_v22 = vmul.f32 %v1017_v2, %v2533_v16  ;;  %v1902_v24 = vpack.i.bf16 %v1179_v19, %v1178_v18  ;;  %v1121_v25 = vmul.f32 %v1113_v61, %v2533_v16  ;;  %v1181_v29 = vmul.f32 %v1173_v3, %v2533_v16  ;;  %v1396_v61 = vpop.permute.xlu0 %1395 }
 0x39c   : > { %1883 = vrot.lane.b32.xlu1 %v1882_v21, %s2150_s19  ;;  %v1026_v26 = vmul.f32 %v1016_v54, %v2538_v20  ;;  %v1892_v27 = vpack.i.bf16 %v2538_v20, %v2533_v16  ;;  %v1122_v28 = vmul.f32 %v1112_v56, %v2538_v20  ;;  %v1182_v30 = vmul.f32 %v1172_v63, %v2538_v20 }
 0x39d   : > { %v1248_v35 = vmul.f32 %v1238_v58, %v2533_v16  ;;  %v1308_v40 = vmul.f32 %v1298_v15, %v2533_v16  ;;  %v1962_v46 = vpack.i.bf16 %v2533_v16, %v2521_v0  ;;  %v1246_v4 = vmul.f32 %v1241_v36, %v2526_v8 }
 0x39e   : > { %v1897_v32 = vpack.i.bf16 %v1026_v26, %v1025_v22  ;;  %v1907_v33 = vpack.i.bf16 %v1122_v28, %v1121_v25  ;;  %v1922_v38 = vpack.i.bf16 %v1182_v30, %v1181_v29  ;;  %v1404_v47 = vmul.f32 %v1394_v37, %v2533_v16  ;;  %v1874_v45 = vpop.permute.xlu1 %1873 }
 0x39f   : > { %v1927_v41 = vpack.i.bf16 %v1248_v35, %v1245_v34  ;;  %v1942_v44 = vpack.i.bf16 %v1308_v40, %v1305_v39  ;;  %v1720_v48 = vpack.c.bf16 %v2538_v20, %v2526_v8  ;;  %v1722_v6 = vpack.c.bf16 %v2533_v16, %v2521_v0  ;;  %v1869_v14 = vpop.permute.xlu0 %1868 }
 0x3a0   : > { %1898 = vrot.lane.b32.xlu0 %v1897_v32, %s2150_s19  ;;  %1888 = vrot.lane.b32.xlu1 %v1887_v23, %s2149_s29  ;;  %v1977_v49 = vpack.i.bf16 %v1404_v47, %v1401_v5  ;;  %v1917_v51 = vpack.i.bf16 %v1247_v42, %v1246_v4  ;;  %v1912_v53 = vpack.i.bf16 %v1177_v7, %v1177_v7  ;;  %v1307_v54 = vmul.f32 0.0, %v1300_v50 }
 0x3a1   : > { %v1306_v56 = vmul.f32 %v1301_v52, %v2526_v8  ;;  %v1249_v58 = vmul.f32 %v1241_v36, %v2538_v20  ;;  %v1947_v59 = vpack.i.bf16 %v2143_v1, %v2526_v8  ;;  %v1309_v60 = vmul.f32 %v1301_v52, %v2538_v20 }
 0x3a2   : > { %v1397_v63 = vsel %vm534_vm6, %v1394_v37, %v1396_v61  ;;  %v1403_v2 = vmul.f32 0.0, %v1396_v61  ;;  %v1952_v9 = vpack.i.bf16 %v2143_v1, %v2538_v20  ;;  %v891_v1 = vld [vmem:[%s2707_s9] sm:$0xff]  ;;  %v1866_v23 = vunpack.i.h.bf16 %v1864_v43 }
 0x3a3   : > { %v1932_v57 = vpack.i.bf16 %v1307_v54, %v1306_v56  ;;  %v1937_v55 = vpack.i.bf16 %v1247_v42, %v1249_v58  ;;  %v1957_v62 = vpack.i.bf16 %v1307_v54, %v1309_v60  ;;  %v1402_v3 = vmul.f32 %v1397_v63, %v2526_v8 }
 0x3a4   : > { %1903 = vrot.lane.b32.xlu0 %v1902_v24, %s2148_s22  ;;  %1893 = vrot.lane.b32.xlu1 %v1892_v27, %s2151_s25  ;;  %v1405_v10 = vmul.f32 %v1397_v63, %v2538_v20  ;;  %v1865_v24 = vunpack.i.l.bf16 %v1864_v43  ;;  %v1871_v37 = vunpack.i.h.bf16 %v1869_v14  ;;  %v1875_v47 = vunpack.i.l.bf16 %v1874_v45 }
 0x3a5   : > { %v1967_v12 = vpack.i.bf16 %v1403_v2, %v1402_v3  ;;  %v1876_v52 = vunpack.i.h.bf16 %v1874_v45 }
 0x3a6   : > { %v1972_v13 = vpack.i.bf16 %v1403_v2, %v1405_v10 }
 0x3a8   : > { %1908 = vrot.lane.b32.xlu0 %v1907_v33, %s2149_s29  ;;  %1918 = vrot.lane.b32.xlu1 %v1917_v51, %s2147_s27 }
 0x3ac   : > { %1913 = vrot.lane.b32.xlu0 %v1912_v53, %s2148_s22  ;;  %1923 = vrot.lane.b32.xlu1 %v1922_v38, %s2148_s22  ;;  %v1870_v38 = vunpack.i.l.bf16 %v1869_v14 }
 0x3b0   : > { %1933 = vrot.lane.b32.xlu0 %v1932_v57, %s2146_s18  ;;  %1928 = vrot.lane.b32.xlu1 %v1927_v41, %s2147_s27 }
 0x3b4   : > { %1938 = vrot.lane.b32.xlu0 %v1937_v55, %s2147_s27  ;;  %1948 = vrot.lane.b32.xlu1 %v1947_v59, %s2152_s30  ;;  %s2070_s27 = sshll.u32 %s2153_s20, 4  ;;  %s2071_s27 = int_to_ptr.vmem [resolvable:$false] %s2070_s27 }
 0x3b5   : > { %s2072_s22 = scalar_lea.vmem %s2071_s27, 1536  ;;  %p2073_p4 = scmp.lt.s32.totalorder %s2650_s21, %s2071_s27 }
 0x3b6   : > { %p2074_p7 = scmp.lt.s32.totalorder %s2072_s22, %s2066_s24 }
 0x3b8   : > { %1943 = vrot.lane.b32.xlu0 %v1942_v44, %s2146_s18  ;;  %1958 = vrot.lane.b32.xlu1 %v1957_v62, %s2146_s18  ;;  %p2075_p8 = por %p2074_p7, %p2073_p4 }
 0x3ba   : > { %p2076_p11 = pnand %p2075_p8, %p2069_p3 }
 0x3bc   : > { %1953 = vrot.lane.b32.xlu0 %v1952_v9, %s2152_s30  ;;  %1963 = vrot.lane.b32.xlu1 %v1962_v46, %s2152_s30  ;;  %s1741_s30 = smul.u32 768, %s2231_s17  ;;  %s2656_s17 = scalar_lea.sflag [#allocation6], %s390_s2 }
 0x3be   : > { %s2648_s28 = scalar_lea.hbm %s2708_s10, %s1741_s30 }
 0x3c0   : > { %1968 = vrot.lane.b32.xlu0 %v1967_v12, %s2145_s11  ;;  %1973 = vrot.lane.b32.xlu1 %v1972_v13, %s2145_s11 }
 0x3c4   : > { %1978 = vrot.lane.b32.xlu0 %v1977_v49, %s2145_s11  ;;  %1475 = vperm.xlu1 %1861, %v891_v1  }
 0x40c   : > { %v1879_v15 = vpop.permute.xlu0 %1878 }
 0x40d   : > { %v1881_v27 = vunpack.i.h.bf16 %v1879_v15  ;;  %v1880_v28 = vunpack.i.l.bf16 %v1879_v15 }
 0x40e   : > { %v1884_v17 = vpop.permute.xlu1 %1883 }
 0x40f   : > { %v1886_v18 = vunpack.i.h.bf16 %v1884_v17  ;;  %v1885_v19 = vunpack.i.l.bf16 %v1884_v17  ;;  %v1082_v44 = vsel %vm553_vm7, %v1880_v28, %v1881_v27  ;;  %v1081_v5 = vsel %vm553_vm7, %v1870_v38, %v1880_v28 }
 0x411   : > { %v1046_v29 = vsel %vm534_vm6, %v1885_v19, %v1886_v18  ;;  %v1045_v31 = vsel %vm534_vm6, %v1865_v24, %v1885_v19 }
 0x412   : > { %v1899_v21 = vpop.permute.xlu0 %1898  ;;  %v1889_v22 = vpop.permute.xlu1 %1888 }
 0x413   : > { %v1901_v25 = vunpack.i.h.bf16 %v1899_v21  ;;  %v1900_v26 = vunpack.i.l.bf16 %v1899_v21  ;;  %v1891_v41 = vunpack.i.h.bf16 %v1889_v22  ;;  %v1890_v42 = vunpack.i.l.bf16 %v1889_v22 }
 0x415   : > { %v1048_v30 = vsel %vm534_vm6, %v1900_v26, %v1901_v25  ;;  %v1047_v32 = vsel %vm534_vm6, %v1866_v23, %v1900_v26  ;;  %v1142_v56 = vsel %vm595_vm5, %v1890_v42, %v1891_v41  ;;  %v1141_v57 = vsel %vm595_vm5, %v1875_v47, %v1890_v42 }
 0x416   : > { %v1904_v33 = vpop.permute.xlu0 %1903  ;;  %v1894_v34 = vpop.permute.xlu1 %1893  ;;  %v1704_v35 = vpack.c.bf16 %v1048_v30, %v1046_v29  ;;  %v1706_v36 = vpack.c.bf16 %v1047_v32, %v1045_v31 }
 0x417   : > { %v1896_v39 = vunpack.i.h.bf16 %v1894_v34  ;;  %v1895_v40 = vunpack.i.l.bf16 %v1894_v34  ;;  %v1906_v58 = vunpack.i.h.bf16 %v1904_v33  ;;  %v1905_v55 = vunpack.i.l.bf16 %v1904_v33 }
 0x418   : > { %1705 = vmatprep.subr.bf16.mxu0 %v1704_v35 }
 0x419   : > { %1707 = vmatpush1.bf16.msra.mxu0 %v1706_v36  ;;  %v1084_v46 = vsel %vm553_vm7, %v1895_v40, %v1896_v39  ;;  %v1083_v4 = vsel %vm553_vm7, %v1871_v37, %v1895_v40  ;;  %v1202_v12 = vsel %vm636_vm4, %v1905_v55, %v1906_v58 }
 0x41a   : > { %v1909_v49 = vpop.permute.xlu0 %1908  ;;  %v1919_v7 = vpop.permute.xlu1 %1918  ;;  %v1708_v50 = vpack.c.bf16 %v1084_v46, %v1082_v44  ;;  %v1710_v51 = vpack.c.bf16 %v1083_v4, %v1081_v5 }
 0x41b   : > { %v1911_v53 = vunpack.i.h.bf16 %v1909_v49  ;;  %v1910_v54 = vunpack.i.l.bf16 %v1909_v49  ;;  %v1921_v18 = vunpack.i.h.bf16 %v1919_v7  ;;  %v1920_v19 = vunpack.i.l.bf16 %v1919_v7 }
 0x41c   : > { %1709 = vmatprep.subr.bf16.mxu0 %v1708_v50 }
 0x41d   : > { %1711 = vmatpush1.bf16.msra.mxu0 %v1710_v51  ;;  %v1144_v59 = vsel %vm595_vm5, %v1910_v54, %v1911_v53  ;;  %v1143_v60 = vsel %vm595_vm5, %v1876_v52, %v1910_v54  ;;  %v1270_v29 = vsel %vm619_vm1, %v1920_v19, %v1921_v18 }
 0x41e   : > { %v1914_v61 = vpop.permute.xlu0 %1913  ;;  %v1924_v62 = vpop.permute.xlu1 %1923  ;;  %v1712_v63 = vpack.c.bf16 %v1144_v59, %v1142_v56  ;;  %v1714_v2 = vpack.c.bf16 %v1143_v60, %v1141_v57 }
 0x41f   : > { %v1916_v3 = vunpack.i.h.bf16 %v1914_v61  ;;  %v1915_v9 = vunpack.i.l.bf16 %v1914_v61  ;;  %v1926_v10 = vunpack.i.h.bf16 %v1924_v62  ;;  %v1925_v11 = vunpack.i.l.bf16 %v1924_v62 }
 0x420   : > { %1713 = vmatprep.subr.bf16.mxu0 %v1712_v63 }
 0x421   : > { %1715 = vmatpush1.bf16.msra.mxu0 %v1714_v2  ;;  %v1204_v13 = vsel %vm636_vm4, %v1925_v11, %v1926_v10  ;;  %v1201_v1 = vsel %vm636_vm4, %v1915_v9, %v1905_v55  ;;  %v1203_v43 = vsel %vm636_vm4, %v1916_v3, %v1925_v11 }
 0x422   : > { %v1934_v14 = vpop.permute.xlu0 %1933  ;;  %v1929_v45 = vpop.permute.xlu1 %1928  ;;  %v1716_v15 = vpack.c.bf16 %v1204_v13, %v1202_v12  ;;  %v1718_v17 = vpack.c.bf16 %v1203_v43, %v1201_v1  ;;  %v889_v13 = vld [vmem:[%s2706_s8] sm:$0xff] }
 0x423   : > { %v1930_v21 = vunpack.i.l.bf16 %v1929_v45  ;;  %v1931_v24 = vunpack.i.h.bf16 %v1929_v45  ;;  %v1936_v27 = vunpack.i.h.bf16 %v1934_v14  ;;  %v1935_v28 = vunpack.i.l.bf16 %v1934_v14 }
 0x424   : > { %1717 = vmatprep.subr.bf16.mxu0 %v1716_v15 }
 0x425   : > { %1719 = vmatpush1.bf16.msra.mxu0 %v1718_v17  ;;  %v1269_v31 = vsel %vm619_vm1, %v1930_v21, %v1920_v19  ;;  %v1330_v0 = vsel %vm578_vm3, %v1935_v28, %v1936_v27 }
 0x426   : > { %v1939_v22 = vpop.permute.xlu0 %1938  ;;  %v1949_v23 = vpop.permute.xlu1 %1948  ;;  %1721 = vmatprep.subr.bf16.mxu0 %v1720_v48 }
 0x427   : > { %v1941_v25 = vunpack.i.h.bf16 %v1939_v22  ;;  %v1940_v26 = vunpack.i.l.bf16 %v1939_v22  ;;  %v1951_v38 = vunpack.i.h.bf16 %v1949_v23  ;;  %v1950_v16 = vunpack.i.l.bf16 %v1949_v23 }
 0x429   : > { %1723 = vmatpush1.bf16.msra.mxu0 %v1722_v6  ;;  %v1272_v30 = vsel %vm619_vm1, %v1940_v26, %v1941_v25  ;;  %v1271_v32 = vsel %vm619_vm1, %v1931_v24, %v1940_v26  ;;  %v1366_v7 = vsel %vm737_vm8, %v1950_v16, %v1951_v38 }
 0x42a   : > { %v1944_v33 = vpop.permute.xlu0 %1943  ;;  %v1959_v8 = vpop.permute.xlu1 %1958  ;;  %v1724_v20 = vpack.c.bf16 %v1272_v30, %v1270_v29  ;;  %v1726_v48 = vpack.c.bf16 %v1271_v32, %v1269_v31 }
 0x42b   : > { %v1946_v34 = vunpack.i.h.bf16 %v1944_v33  ;;  %v1945_v35 = vunpack.i.l.bf16 %v1944_v33  ;;  %v1961_v36 = vunpack.i.h.bf16 %v1959_v8  ;;  %v1960_v37 = vunpack.i.l.bf16 %v1959_v8 }
 0x42c   : > { %1725 = vmatprep.subr.bf16.mxu0 %v1724_v20 }
 0x42d   : > { %1727 = vmatpush1.bf16.msra.mxu0 %v1726_v48  ;;  %v1332_v6 = vsel %vm578_vm3, %v1960_v37, %v1961_v36  ;;  %v1329_v39 = vsel %vm578_vm3, %v1945_v35, %v1935_v28  ;;  %v1331_v40 = vsel %vm578_vm3, %v1946_v34, %v1960_v37 }
 0x42e   : > { %v1954_v41 = vpop.permute.xlu0 %1953  ;;  %v1964_v42 = vpop.permute.xlu1 %1963  ;;  %v1728_v44 = vpack.c.bf16 %v1332_v6, %v1330_v0  ;;  %v1730_v46 = vpack.c.bf16 %v1331_v40, %v1329_v39 }
 0x42f   : > { %v1956_v5 = vunpack.i.h.bf16 %v1954_v41  ;;  %v1955_v4 = vunpack.i.l.bf16 %v1954_v41  ;;  %v1966_v47 = vunpack.i.h.bf16 %v1964_v42  ;;  %v1965_v49 = vunpack.i.l.bf16 %v1964_v42 }
 0x430   : > { %1729 = vmatprep.subr.bf16.mxu0 %v1728_v44 }
 0x431   : > { %1731 = vmatpush1.bf16.msra.mxu0 %v1730_v46  ;;  %v1368_v50 = vsel %vm737_vm8, %v1955_v4, %v1956_v5  ;;  %v1365_v51 = vsel %vm737_vm8, %v1965_v49, %v1950_v16  ;;  %v1367_v52 = vsel %vm737_vm8, %v1966_v47, %v1955_v4 }
 0x432   : > { %v1969_v53 = vpop.permute.xlu0 %1968  ;;  %v1974_v54 = vpop.permute.xlu1 %1973  ;;  %v1732_v56 = vpack.c.bf16 %v1368_v50, %v1366_v7  ;;  %v1734_v57 = vpack.c.bf16 %v1367_v52, %v1365_v51 }
 0x433   : > { %v1971_v58 = vunpack.i.h.bf16 %v1969_v53  ;;  %v1970_v55 = vunpack.i.l.bf16 %v1969_v53  ;;  %v1976_v59 = vunpack.i.h.bf16 %v1974_v54  ;;  %v1975_v60 = vunpack.i.l.bf16 %v1974_v54 }
 0x434   : > { %1733 = vmatprep.subr.bf16.mxu0 %v1732_v56 }
 0x435   : > { %1735 = vmatpush1.bf16.msra.mxu0 %v1734_v57  ;;  %v1426_v61 = vsel %vm517_vm2, %v1970_v55, %v1971_v58  ;;  %v1428_v62 = vsel %vm517_vm2, %v1975_v60, %v1976_v59 }
 0x436   : > { %v1979_v63 = vpop.permute.xlu0 %1978  ;;  %v1736_v2 = vpack.c.bf16 %v1428_v62, %v1426_v61 }
 0x437   : > { %v1981_v3 = vunpack.i.h.bf16 %v1979_v63  ;;  %v1980_v9 = vunpack.i.l.bf16 %v1979_v63 }
 0x438   : > { %1737 = vmatprep.subr.bf16.mxu0 %v1736_v2 }
 0x439   : > { %v1425_v10 = vsel %vm517_vm2, %v1980_v9, %v1970_v55  ;;  %v1427_v11 = vsel %vm517_vm2, %v1981_v3, %v1975_v60 }
 0x43a   : > { %v1738_v12 = vpack.c.bf16 %v1427_v11, %v1425_v10 }
 0x43c   : > { %1739 = vmatpush1.bf16.msra.mxu0 %v1738_v12 }
 0x43f   : > { %1546 = vmatmul.mubr.f32.vlgmr.msra.gmra.mrb[0].mxu0 %v889_v13 }
 0x443   : > { %v1476_v1 = vpop.permute.xlu1 %1475 }
 0x512   : > { %v1547_v43 = vpop.f32.mrb[0].mxu0 }
 0x513   : > { %v1548_v14 = vadd.f32 %v1547_v43, %v1476_v1  ;;  %v1549_v45 = vpop.f32.mrb[1].mxu0 }
 0x514   : > { %v1550_v15 = vadd.f32 %v1549_v45, %v1476_v1 }
 0x515   : > { %v1552_v17 = vmax.f32 %v1548_v14, 0.0 }
 0x516   : > { %v1553_v18 = vmax.f32 %v1550_v15, 0.0 }
 0x517   : > { %1554 = vst [vmem:[%s2368_s15 + $0x20] sm:$0xff] %v1552_v17 }
 0x518   : > { %1555 = vst [vmem:[%s2368_s15 + $0x28] sm:$0xff] %v1553_v18 }
 0x519   : > { %2079 = shalt.err (!%p2076_p11)
}
 0x51a   : > { %s2080_s2 = scalar_lea.hbm %s2648_s28, 768  ;;  %s2084_s29 = scalar_lea.hbm %s2708_s10, 1536 }
 0x51b   : > { %p2081_p13 = scmp.ne.s32.totalorder %s2648_s28, %s2080_s2  ;;  %p2085_p6 = scmp.lt.u32.totalorder %s2648_s28, %s2708_s10 }
 0x51c   : > { %p2086_p5 = scmp.lt.u32.totalorder %s2084_s29, %s2080_s2  ;;  %p2088_p9 = scmp.lt.u32.totalorder %s2080_s2, %s2648_s28 }
 0x51d   : > { %p2082_p1 = pnand %p2081_p13, %p2732_p10 }
 0x51e   : > { %p2087_p12 = por %p2086_p5, %p2085_p6 }
 0x51f   : > { %p2083_p0 = pneg %p2082_p1 }
 0x520   : > { %p2089_p2 = por %p2088_p9, %p2087_p12 }
 0x522   : > { %p2090_p3 = pnand %p2089_p2, %p2083_p0 }
 0x524   : > { %2093 = shalt.err (!%p2090_p3)
}
 0x525   : > { %s2154_s30 = smov 256  }
 0x526   : > { %1754 = dma.vmem_to_hbm [thread:$0]  (%p2732_p10), %s2650_s21, 768, %s2648_s28, %s2656_s17, %s2154_s30, %s2154_s30, %s2151_s25  }
 0x527 PF: > { %s2733_s26 = sld [smem:[#allocation17_spill]]  ;;  %p1776_p4 = scmp.ge.s32.totalorder %s2136_s16, 2 }
 0x528   : > { %s1585_s12 = sand.u32 1, %s2124_s13  }
 0x529   : > { %s1586_s24 = scalar_lea.sflag [#allocation6], %s1585_s12 }
 0x52d   : > { %p2734_p7 = scmp.ne.s32.totalorder %s2733_s26, 0 }
 0x52f   : > { %p1767_p8 = pnand %p1776_p4, %p2734_p7 }
 0x531   : > { %2119 = dma.done.wait (!%p1767_p8), %s1586_s24, 768  }
 0x532   : > { %2121 = vsyncadd (!%p1767_p8), %s1586_s24, 4294966528  ;;  %s2735_s16 = sld [smem:[#allocation15_spill]]  ;;  %s2736_s20 = sld [smem:[#allocation14_spill]] }
 0x533   : > { %s2737_s15 = sld [smem:[#allocation16_spill]]  ;;  %s2738_s13 = smov %s2128_s14 }
 0x538   : > { %p22_p11 = scmp.ge.s32.totalorder %s2735_s16, 4   ;;  %s2739_s14 = smov %s2736_s20 }
 0x53a   :  { %24 = sbr.rel (!%p22_p11) target bundleno = 7 (0x7), region = 109 }
 0x541   :  { %1591 = vsyncpa [#allocation5], 1 }
 0x542   :  { %1593 = vsyncpa [#allocation5 + $0x1], 1 }
 0x543   :  { %1594 = vsyncpa [#allocation8], 1 }
 0x544   :  { %1595 = vsyncpa [#allocation6], 1 }
 0x545   :  { %1597 = vsyncpa [#allocation6 + $0x1], 1 }

</bundles_post_ra>
